<compile_context>
chip_gen: v5e
topology: v5e:2x2
jax: 0.10.0
libtpu: 0.0.40
codegen_flags: <defaults>
</compile_context>

<pallas_src>
import functools

import jax
import jax.numpy as jnp
from jax.experimental import pallas as pl
from jax.experimental.pallas import tpu as pltpu


def gnn_kernel(catT_ref, w1T_ref, b1_ref, w2T_ref, b2_ref, out_ref):
    # Transposed compute layout: features/groups on sublanes, nodes on lanes
    # (all intermediates lane-dense; tiny weights broadcast from VMEM).
    catT = catT_ref[...]                                   # [in_dim+G, TM] f32

    # x1^T = relu( W1cat^T @ cat^T + b1' )   (embedding Linear already folded in)
    h1 = jnp.dot(w1T_ref[...], catT,
                 preferred_element_type=jnp.float32) + b1_ref[...]     # [H, TM]
    x1 = jnp.maximum(h1, 0.0)

    # x2^T = relu( W2^T @ x1^T + b2 )
    h2 = jnp.dot(w2T_ref[...], x1,
                 preferred_element_type=jnp.float32) + b2_ref[...]     # [H, TM]
    x2 = jnp.maximum(h2, 0.0)

    # In-kernel XLU transpose so the [N, H] result is written directly
    # (no wrapper transpose pass over the output).
    out_ref[...] = jnp.transpose(x2, (1, 0)).astype(out_ref.dtype)     # [TM, H]


@functools.partial(jax.jit, static_argnames=("tile_n",))
def gnn_forward(x, label, params, tile_n=8192):
    """x: [N, in_dim] f32, label: [N] int  ->  [N, n_hidden] f32."""
    n, in_dim = x.shape
    n_hidden = params["w_emb"].shape[1]
    num_grp = params["w_agg1_grp"].shape[0]

    # ---- algebraic fold + layer-1 weight fusion (tiny, one-time) --------------
    w_xe = params["w_emb"] @ params["w_agg1_emb"]                       # [in_dim, H]
    b1 = params["b_emb"] @ params["w_agg1_emb"] + params["b_agg1"]      # [1, H]
    w1_cat_t = jnp.concatenate([w_xe, params["w_agg1_grp"]], axis=0).T  # [H, in_dim+G]
    b1_t = b1.T                                                         # [H, 1]
    w2_t = params["w_agg2"].T                                           # [H, H]
    b2_t = params["b_agg2"].T                                           # [H, 1]

    # ---- single fused prep pass: one_hot + concat + transpose -----------------
    # Replaces the previous pad+transpose of x and the separate label stream.
    # If the producer can supply this [in_dim+G, N] slab directly, it vanishes.
    onehot = jax.nn.one_hot(label, num_grp, dtype=x.dtype)              # [N, G]
    cat_t = jnp.concatenate([x, onehot], axis=1).T                      # [in_dim+G, N]

    # ---- node-axis tiling (nodes on lanes) -------------------------------------
    if n <= tile_n:
        tile = n                                    # single block == full extent
    else:
        tile = max(128, (min(tile_n, 32768) // 128) * 128)   # lane-aligned tile
    grid = (pl.cdiv(n, tile),)                      # partial last block is masked
    const = lambda i: (0, 0)                        # weights stay VMEM-resident

    return pl.pallas_call(
        gnn_kernel,
        out_shape=jax.ShapeDtypeStruct((n, n_hidden), jnp.float32),
        grid=grid,
        in_specs=[
            pl.BlockSpec((in_dim + num_grp, tile), lambda i: (0, i)),   # cat^T (tiled on N)
            pl.BlockSpec((n_hidden, in_dim + num_grp), const),          # W1cat^T
            pl.BlockSpec((n_hidden, 1), const),                         # b1'
            pl.BlockSpec((n_hidden, n_hidden), const),                  # W2^T
            pl.BlockSpec((n_hidden, 1), const),                         # b2
        ],
        out_specs=pl.BlockSpec((tile, n_hidden), lambda i: (i, 0)),
        compiler_params=pltpu.CompilerParams(
            dimension_semantics=("parallel",),
            vmem_limit_bytes=48 * 1024 * 1024,
        ),
    )(cat_t, w1_cat_t, b1_t, w2_t, b2_t)


def init_params(key, in_dim, n_hidden, num_grp):
    """Deterministic init mimicking torch.nn.Linear default (uniform +-1/sqrt(fan_in)).
    Weights stored as [fan_in, fan_out] (i.e. already transposed vs torch)."""
    def linear(k, fan_in, fan_out):
        kw, kb = jax.random.split(k)
        bound = 1.0 / jnp.sqrt(fan_in)
        w = jax.random.uniform(kw, (fan_in, fan_out), jnp.float32, -bound, bound)
        b = jax.random.uniform(kb, (1, fan_out), jnp.float32, -bound, bound)
        return w, b

    k_emb, k_agg1, k_agg2 = jax.random.split(key, 3)
    w_emb, b_emb = linear(k_emb, in_dim, n_hidden)
    w_agg1, b_agg1 = linear(k_agg1, n_hidden + num_grp, n_hidden)
    w_agg2, b_agg2 = linear(k_agg2, n_hidden, n_hidden)
    return {
        "w_emb": w_emb, "b_emb": b_emb,
        "w_agg1_emb": w_agg1[:n_hidden],   # part of agg_1 acting on the embedding
        "w_agg1_grp": w_agg1[n_hidden:],   # part of agg_1 acting on the one-hot labels
        "b_agg1": b_agg1,
        "w_agg2": w_agg2, "b_agg2": b_agg2,
    }


def gnn_reference(x, label, params, num_grp):
    """Pure-JAX reference of the PyTorch forward (no folding) for correctness."""
    onehot = jax.nn.one_hot(label, num_grp, dtype=jnp.float32)
    emb = x @ params["w_emb"] + params["b_emb"]
    cat = jnp.concatenate([emb, onehot], axis=1)
    w_agg1 = jnp.concatenate([params["w_agg1_emb"], params["w_agg1_grp"]], axis=0)
    x1 = jax.nn.relu(cat @ w_agg1 + params["b_agg1"])
    x2 = jax.nn.relu(x1 @ params["w_agg2"] + params["b_agg2"])
    return x2


if __name__ == "__main__":
    N, in_dim, n_hidden, num_grp = 2048, 4, 32, 4

    key = jax.random.PRNGKey(0)
    k_x, k_lbl, k_p = jax.random.split(key, 3)
    x = jax.random.normal(k_x, (N, in_dim), jnp.float32)
    label = jax.random.randint(k_lbl, (N,), 0, num_grp, jnp.int32)
    params = init_params(k_p, in_dim, n_hidden, num_grp)

    ref = gnn_reference(x, label, params, num_grp)

    # Default path (single large tile) and an explicit multi-step grid
    # (tile_n=512 -> 4 grid steps: exercises pipelining + resident weights).
    out = gnn_forward(x, label, params)
    jax.block_until_ready(out)
    out_tiled = gnn_forward(x, label, params, tile_n=512)
    jax.block_until_ready(out_tiled)

    assert out.shape == (N, n_hidden)
    # Embedding fold reassociates the f32 math slightly; keep a small tolerance.
    assert jnp.allclose(out, ref, atol=5e-4, rtol=5e-4)
    assert jnp.allclose(out_tiled, ref, atol=5e-4, rtol=5e-4)

    print("KERNEL_OK")
</pallas_src>

<mosaic_0001>
module attributes {stable_mosaic.version = 11 : i64} {
  func.func @gnn_kernel(%arg0: i32, %arg1: memref<8x2048xf32, #tpu.memory_space<vmem>>, %arg2: memref<32x8xf32, #tpu.memory_space<vmem>>, %arg3: memref<32x1xf32, #tpu.memory_space<vmem>>, %arg4: memref<32x32xf32, #tpu.memory_space<vmem>>, %arg5: memref<32x1xf32, #tpu.memory_space<vmem>>, %arg6: memref<2048x32xf32, #tpu.memory_space<vmem>>) attributes {dimension_semantics = [#tpu.dimension_semantics<parallel>], iteration_bounds = array<i64: 1>, scalar_prefetch = 0 : i64, scratch_operands = 0 : i64, tpu.core_type = #tpu.core_type<tc>, window_params = [{transform_indices = @transform_0, window_bounds = array<i64: 8, 2048>}, {pipeline_mode = #tpu.pipeline_mode<synchronous>, transform_indices = @transform_1, window_bounds = array<i64: 32, 8>}, {pipeline_mode = #tpu.pipeline_mode<synchronous>, transform_indices = @transform_2, window_bounds = array<i64: 32, 1>}, {pipeline_mode = #tpu.pipeline_mode<synchronous>, transform_indices = @transform_3, window_bounds = array<i64: 32, 32>}, {pipeline_mode = #tpu.pipeline_mode<synchronous>, transform_indices = @transform_4, window_bounds = array<i64: 32, 1>}, {transform_indices = @transform_5, window_bounds = array<i64: 2048, 32>}]} {
    %c0 = arith.constant 0 : index
    %c0_0 = arith.constant 0 : index
    %0 = vector.load %arg1[%c0, %c0_0] : memref<8x2048xf32, #tpu.memory_space<vmem>>, vector<8x2048xf32>
    %c0_1 = arith.constant 0 : index
    %c0_2 = arith.constant 0 : index
    %1 = vector.load %arg2[%c0_1, %c0_2] : memref<32x8xf32, #tpu.memory_space<vmem>>, vector<32x8xf32>
    %cst = arith.constant dense<0.000000e+00> : vector<32x2048xf32>
    %2 = tpu.matmul %1, %0, %cst {dimension_numbers = #tpu.dot_dimension_numbers<[1], [0], [0], [1], [0, 0, 1, 1], [], []>} : vector<32x8xf32>, vector<8x2048xf32>, vector<32x2048xf32> -> vector<32x2048xf32>
    %c0_3 = arith.constant 0 : index
    %c0_4 = arith.constant 0 : index
    %3 = vector.load %arg3[%c0_3, %c0_4] : memref<32x1xf32, #tpu.memory_space<vmem>>, vector<32x1xf32>
    %4 = vector.broadcast %3 : vector<32x1xf32> to vector<32x2048xf32>
    %5 = arith.addf %2, %4 : vector<32x2048xf32>
    %cst_5 = arith.constant 0.000000e+00 : f32
    %6 = vector.broadcast %cst_5 : f32 to vector<32x2048xf32>
    %7 = arith.maximumf %5, %6 : vector<32x2048xf32>
    %c0_6 = arith.constant 0 : index
    %c0_7 = arith.constant 0 : index
    %8 = vector.load %arg4[%c0_6, %c0_7] : memref<32x32xf32, #tpu.memory_space<vmem>>, vector<32x32xf32>
    %cst_8 = arith.constant dense<0.000000e+00> : vector<32x2048xf32>
    %9 = tpu.matmul %8, %7, %cst_8 {dimension_numbers = #tpu.dot_dimension_numbers<[1], [0], [0], [1], [0, 0, 1, 1], [], []>} : vector<32x32xf32>, vector<32x2048xf32>, vector<32x2048xf32> -> vector<32x2048xf32>
    %c0_9 = arith.constant 0 : index
    %c0_10 = arith.constant 0 : index
    %10 = vector.load %arg5[%c0_9, %c0_10] : memref<32x1xf32, #tpu.memory_space<vmem>>, vector<32x1xf32>
    %11 = vector.broadcast %10 : vector<32x1xf32> to vector<32x2048xf32>
    %12 = arith.addf %9, %11 : vector<32x2048xf32>
    %cst_11 = arith.constant 0.000000e+00 : f32
    %13 = vector.broadcast %cst_11 : f32 to vector<32x2048xf32>
    %14 = arith.maximumf %12, %13 : vector<32x2048xf32>
    %15 = tpu.transpose %14, [1, 0] : vector<32x2048xf32> -> vector<2048x32xf32>
    %c0_12 = arith.constant 0 : index
    %c0_13 = arith.constant 0 : index
    %16 = vector.load %arg6[%c0_12, %c0_13] : memref<2048x32xf32, #tpu.memory_space<vmem>>, vector<2048x32xf32>
    tpu.vector_store %arg6[%c0_12, %c0_13], %15 {strides = array<i32>} : memref<2048x32xf32, #tpu.memory_space<vmem>>, vector<2048x32xf32>,
    return
  }
  func.func @transform_0(%arg0: i32) -> (i32, i32) {
    %c0_i32 = arith.constant 0 : i32
    %c0_i32_0 = arith.constant 0 : i32
    return %c0_i32, %arg0 : i32, i32
  }
  func.func @transform_1(%arg0: i32) -> (i32, i32) {
    %c0_i32 = arith.constant 0 : i32
    %c0_i32_0 = arith.constant 0 : i32
    %c0_i32_1 = arith.constant 0 : i32
    return %c0_i32, %c0_i32_0 : i32, i32
  }
  func.func @transform_2(%arg0: i32) -> (i32, i32) {
    %c0_i32 = arith.constant 0 : i32
    %c0_i32_0 = arith.constant 0 : i32
    %c0_i32_1 = arith.constant 0 : i32
    return %c0_i32, %c0_i32_0 : i32, i32
  }
  func.func @transform_3(%arg0: i32) -> (i32, i32) {
    %c0_i32 = arith.constant 0 : i32
    %c0_i32_0 = arith.constant 0 : i32
    %c0_i32_1 = arith.constant 0 : i32
    return %c0_i32, %c0_i32_0 : i32, i32
  }
  func.func @transform_4(%arg0: i32) -> (i32, i32) {
    %c0_i32 = arith.constant 0 : i32
    %c0_i32_0 = arith.constant 0 : i32
    %c0_i32_1 = arith.constant 0 : i32
    return %c0_i32, %c0_i32_0 : i32, i32
  }
  func.func @transform_5(%arg0: i32) -> (i32, i32) {
    %c0_i32 = arith.constant 0 : i32
    %c0_i32_0 = arith.constant 0 : i32
    return %arg0, %c0_i32 : i32, i32
  }
}

</mosaic_0001>

<bundles_post_ra>
// kernel: gnn_forward.1
= control target key start
LH: loop header
LB: loop body
LE: loop exit
PB: predicated region body
PF: predicated region fallthrough
CT: control target
= control target key end

     0   :  { %vm64_vm0 = vcmask 64512   ;;  %v2079_v3 = vmov 0   ;;  %vm633_vm1 = vcmask 261120   ;;  %s3682_s0 = inlined_call_operand.vmem [shape: f32[8,2048], index: 0, kind: input, shape index: {}]   ;;  %s3683_s1 = inlined_call_operand.vmem [shape: f32[32,8], index: 1, kind: input, shape index: {}]   ;;  %s3684_s2 = inlined_call_operand.vmem [shape: f32[32,1], index: 2, kind: input, shape index: {}]   ;;  %s3685_s4 = inlined_call_operand.vmem [shape: f32[32,1], index: 4, kind: input, shape index: {}]   ;;  %s3686_s3 = inlined_call_operand.vmem [shape: f32[32,32], index: 3, kind: input, shape index: {}]   ;;  %s3687_s5 = inlined_call_operand.vmem [shape: f32[2048,32], index: 5, kind: output, shape index: {}]  }
   0x1   :  { %v20_v0 = vld [vmem:[%s3682_s0] sm:$0xff]  ;;  %v21_v1 = vld [vmem:[%s3682_s0 + $0x8] sm:$0xff]  ;;  %v22_v2 = vld [vmem:[%s3682_s0 + $0x10] sm:$0xff]  ;;  %2077 = vset.pattern.permute.xlu1 %v2079_v3  ;;  %2076 = vset.pattern.permute.xlu0 %v2079_v3 }
   0x2   :  { %92 = vmatpush.msra.mxu0 %v20_v0  ;;  %121 = vmatpush.msra.mxu1 %v21_v1  ;;  %v23_v4 = vld [vmem:[%s3682_s0 + $0x18] sm:$0xff]  ;;  %v2125_v5 = vld [vmem:[%s3683_s1] sm:$0xff]  ;;  %v42_v6 = vld [vmem:[%s3684_s2 + $0x10] sm:$0xff] }
   0x3   :  { %150 = vmatpush.msra.mxu2 %v22_v2  ;;  %179 = vmatpush.msra.mxu3 %v23_v4  ;;  %v40_v7 = vld [vmem:[%s3684_s2] sm:$0xff]  ;;  %v25_v9 = vld [vmem:[%s3682_s0 + $0x28] sm:$0xff]  ;;  %v26_v10 = vld [vmem:[%s3682_s0 + $0x30] sm:$0xff] }
   0x4   :  { %1946 = vmatmul.msk.f32.vlgmr.msra.gmra.mxu0 %vm64_vm0, %v2125_v5  ;;  %1950 = vmatmul.msk.f32.vlgmr.msra.gmra.mxu1 %vm64_vm0, %v2125_v5  ;;  %v24_v8 = vld [vmem:[%s3682_s0 + $0x20] sm:$0xff]  ;;  %v27_v11 = vld [vmem:[%s3682_s0 + $0x38] sm:$0xff]  ;;  %v2156_v12 = vld [vmem:[%s3683_s1 + $0x8] sm:$0xff] }
   0x5   :  { %1954 = vmatmul.msk.f32.vlgmr.msra.gmra.mxu2 %vm64_vm0, %v2125_v5  ;;  %1958 = vmatmul.msk.f32.vlgmr.msra.gmra.mxu3 %vm64_vm0, %v2125_v5  ;;  %v43_v13 = vld [vmem:[%s3684_s2 + $0x18] sm:$0xff]  ;;  %v41_v14 = vld [vmem:[%s3684_s2 + $0x8] sm:$0xff]  ;;  %v2175_v15 = vld [vmem:[%s3683_s1 + $0x10] sm:$0xff] }
   0x6   :  { %56 = vperm.xlu1 %2077, %v42_v6   ;;  %46 = vperm.xlu0 %2076, %v40_v7   ;;  %v612_v16 = vld [vmem:[%s3685_s4 + $0x18] sm:$0xff]  ;;  %v611_v17 = vld [vmem:[%s3685_s4 + $0x10] sm:$0xff]  ;;  %v28_v19 = vld [vmem:[%s3682_s0 + $0x40] sm:$0xff] }
   0x7   :  { %208 = vmatpush.msrb.mxu0 %v24_v8  ;;  %237 = vmatpush.msrb.mxu1 %v25_v9  ;;  %v2194_v18 = vld [vmem:[%s3683_s1 + $0x18] sm:$0xff]  ;;  %v29_v20 = vld [vmem:[%s3682_s0 + $0x48] sm:$0xff]  ;;  %v30_v21 = vld [vmem:[%s3682_s0 + $0x50] sm:$0xff] }
   0x8   :  { %266 = vmatpush.msrb.mxu2 %v26_v10  ;;  %295 = vmatpush.msrb.mxu3 %v27_v11  ;;  %v31_v22 = vld [vmem:[%s3682_s0 + $0x58] sm:$0xff]  ;;  %v32_v23 = vld [vmem:[%s3682_s0 + $0x60] sm:$0xff]  ;;  %v33_v24 = vld [vmem:[%s3682_s0 + $0x68] sm:$0xff] }
   0x9   :  { %2078 = vset.pattern.permute.xlu2 %v2079_v3  ;;  %324 = vmatpush.msra.mxu0 %v28_v19  ;;  %v34_v25 = vld [vmem:[%s3682_s0 + $0x70] sm:$0xff]  ;;  %v35_v26 = vld [vmem:[%s3682_s0 + $0x78] sm:$0xff]  ;;  %v609_v3 = vld [vmem:[%s3685_s4] sm:$0xff] }
   0xa   :  { %353 = vmatpush.msra.mxu1 %v29_v20  ;;  %382 = vmatpush.msra.mxu2 %v30_v21  ;;  %v2356_v10 = vld [vmem:[%s3686_s3] sm:$0xff] }
   0xb   :  { %411 = vmatpush.msra.mxu3 %v31_v22  ;;  %615 = vperm.xlu2 %2078, %v609_v3  }
   0xc   :  { %1947 = vmatmul.msk.f32.gmra.mxu0 %vm64_vm0, %v2156_v12  ;;  %1951 = vmatmul.msk.f32.gmra.mxu1 %vm64_vm0, %v2156_v12 }
   0xd   :  { %1955 = vmatmul.msk.f32.gmra.mxu2 %vm64_vm0, %v2156_v12  ;;  %1959 = vmatmul.msk.f32.gmra.mxu3 %vm64_vm0, %v2156_v12 }
   0xe   :  { %61 = vperm.xlu1 %2077, %v43_v13   ;;  %51 = vperm.xlu0 %2076, %v41_v14  }
  0x14   :  { %1948 = vmatmul.msk.f32.gmra.mxu0 %vm64_vm0, %v2175_v15  ;;  %1952 = vmatmul.msk.f32.gmra.mxu1 %vm64_vm0, %v2175_v15 }
  0x15   :  { %1956 = vmatmul.msk.f32.gmra.mxu2 %vm64_vm0, %v2175_v15  ;;  %1960 = vmatmul.msk.f32.gmra.mxu3 %vm64_vm0, %v2175_v15 }
  0x16   :  { %630 = vperm.xlu1 %2077, %v612_v16   ;;  %625 = vperm.xlu0 %2076, %v611_v17  }
  0x1c   :  { %1949 = vmatmul.msk.f32.gmra.mxu0 %vm64_vm0, %v2194_v18  ;;  %1953 = vmatmul.msk.f32.gmra.mxu1 %vm64_vm0, %v2194_v18 }
  0x1d   :  { %1957 = vmatmul.msk.f32.gmra.mxu2 %vm64_vm0, %v2194_v18  ;;  %1961 = vmatmul.msk.f32.gmra.mxu3 %vm64_vm0, %v2194_v18 }
  0x24   :  { %1962 = vmatmul.msk.f32.vlgmr.msrb.gmra.mxu0 %vm64_vm0, %v2125_v5  ;;  %1966 = vmatmul.msk.f32.vlgmr.msrb.gmra.mxu1 %vm64_vm0, %v2125_v5 }
  0x25   :  { %1970 = vmatmul.msk.f32.vlgmr.msrb.gmra.mxu2 %vm64_vm0, %v2125_v5  ;;  %1974 = vmatmul.msk.f32.vlgmr.msrb.gmra.mxu3 %vm64_vm0, %v2125_v5 }
  0x26   :  { %440 = vmatpush.msrb.mxu0 %v32_v23  ;;  %469 = vmatpush.msrb.mxu1 %v33_v24  ;;  %v610_v23 = vld [vmem:[%s3685_s4 + $0x8] sm:$0xff] }
  0x27   :  { %498 = vmatpush.msrb.mxu2 %v34_v25  ;;  %527 = vmatpush.msrb.mxu3 %v35_v26  ;;  %v2374_v24 = vld [vmem:[%s3686_s3 + $0x8] sm:$0xff] }
  0x28   :  { %620 = vperm.xlu2 %2078, %v610_v23  }
  0x2c   :  { %1963 = vmatmul.msk.f32.gmra.mxu0 %vm64_vm0, %v2156_v12  ;;  %1967 = vmatmul.msk.f32.gmra.mxu1 %vm64_vm0, %v2156_v12 }
  0x2d   :  { %1971 = vmatmul.msk.f32.gmra.mxu2 %vm64_vm0, %v2156_v12  ;;  %1975 = vmatmul.msk.f32.gmra.mxu3 %vm64_vm0, %v2156_v12 }
  0x34   :  { %1964 = vmatmul.msk.f32.gmra.mxu0 %vm64_vm0, %v2175_v15  ;;  %1968 = vmatmul.msk.f32.gmra.mxu1 %vm64_vm0, %v2175_v15 }
  0x35   :  { %1972 = vmatmul.msk.f32.gmra.mxu2 %vm64_vm0, %v2175_v15  ;;  %1976 = vmatmul.msk.f32.gmra.mxu3 %vm64_vm0, %v2175_v15 }
  0x3c   :  { %1965 = vmatmul.msk.f32.gmra.mxu0 %vm64_vm0, %v2194_v18  ;;  %1969 = vmatmul.msk.f32.gmra.mxu1 %vm64_vm0, %v2194_v18 }
  0x3d   :  { %1973 = vmatmul.msk.f32.gmra.mxu2 %vm64_vm0, %v2194_v18  ;;  %1977 = vmatmul.msk.f32.gmra.mxu3 %vm64_vm0, %v2194_v18 }
  0x44   :  { %1978 = vmatmul.msk.f32.vlgmr.msra.gmra.mxu0 %vm64_vm0, %v2125_v5  ;;  %1982 = vmatmul.msk.f32.vlgmr.msra.gmra.mxu1 %vm64_vm0, %v2125_v5 }
  0x45   :  { %1986 = vmatmul.msk.f32.vlgmr.msra.gmra.mxu2 %vm64_vm0, %v2125_v5  ;;  %1990 = vmatmul.msk.f32.vlgmr.msra.gmra.mxu3 %vm64_vm0, %v2125_v5 }
  0x4c   :  { %1979 = vmatmul.msk.f32.gmra.mxu0 %vm64_vm0, %v2156_v12  ;;  %1983 = vmatmul.msk.f32.gmra.mxu1 %vm64_vm0, %v2156_v12 }
  0x4d   :  { %1987 = vmatmul.msk.f32.gmra.mxu2 %vm64_vm0, %v2156_v12  ;;  %1991 = vmatmul.msk.f32.gmra.mxu3 %vm64_vm0, %v2156_v12 }
  0x54   :  { %1980 = vmatmul.msk.f32.gmra.mxu0 %vm64_vm0, %v2175_v15  ;;  %1984 = vmatmul.msk.f32.gmra.mxu1 %vm64_vm0, %v2175_v15 }
  0x55   :  { %1988 = vmatmul.msk.f32.gmra.mxu2 %vm64_vm0, %v2175_v15  ;;  %1992 = vmatmul.msk.f32.gmra.mxu3 %vm64_vm0, %v2175_v15 }
  0x5c   :  { %1981 = vmatmul.msk.f32.gmra.mxu0 %vm64_vm0, %v2194_v18  ;;  %1985 = vmatmul.msk.f32.gmra.mxu1 %vm64_vm0, %v2194_v18 }
  0x5d   :  { %1989 = vmatmul.msk.f32.gmra.mxu2 %vm64_vm0, %v2194_v18  ;;  %1993 = vmatmul.msk.f32.gmra.mxu3 %vm64_vm0, %v2194_v18 }
  0x64   :  { %1994 = vmatmul.msk.f32.vlgmr.msrb.gmra.mxu0 %vm64_vm0, %v2125_v5  ;;  %1998 = vmatmul.msk.f32.vlgmr.msrb.gmra.mxu1 %vm64_vm0, %v2125_v5 }
  0x65   :  { %2002 = vmatmul.msk.f32.vlgmr.msrb.gmra.mxu2 %vm64_vm0, %v2125_v5  ;;  %2006 = vmatmul.msk.f32.vlgmr.msrb.gmra.mxu3 %vm64_vm0, %v2125_v5 }
  0x6c   :  { %1995 = vmatmul.msk.f32.gmra.mxu0 %vm64_vm0, %v2156_v12  ;;  %1999 = vmatmul.msk.f32.gmra.mxu1 %vm64_vm0, %v2156_v12 }
  0x6d   :  { %2003 = vmatmul.msk.f32.gmra.mxu2 %vm64_vm0, %v2156_v12  ;;  %2007 = vmatmul.msk.f32.gmra.mxu3 %vm64_vm0, %v2156_v12 }
  0x74   :  { %1996 = vmatmul.msk.f32.gmra.mxu0 %vm64_vm0, %v2175_v15  ;;  %2000 = vmatmul.msk.f32.gmra.mxu1 %vm64_vm0, %v2175_v15 }
  0x75   :  { %2004 = vmatmul.msk.f32.gmra.mxu2 %vm64_vm0, %v2175_v15  ;;  %2008 = vmatmul.msk.f32.gmra.mxu3 %vm64_vm0, %v2175_v15 }
  0x78   :  { %v2324_v33 = vpop.permute.xlu1 %56  ;;  %v2326_v34 = vpop.permute.xlu0 %46 }
  0x7c   :  { %1997 = vmatmul.msk.f32.gmra.mxu0 %vm64_vm0, %v2194_v18  ;;  %2001 = vmatmul.msk.f32.gmra.mxu1 %vm64_vm0, %v2194_v18 }
  0x7d   :  { %2005 = vmatmul.msk.f32.gmra.mxu2 %vm64_vm0, %v2194_v18  ;;  %2009 = vmatmul.msk.f32.gmra.mxu3 %vm64_vm0, %v2194_v18 }
  0x80   :  { %v2328_v39 = vpop.permute.xlu1 %61  ;;  %v2330_v40 = vpop.permute.xlu0 %51 }
  0x81   :  { %v94_v27 = vpop.f32.mrf.mxu0  ;;  %v123_v28 = vpop.f32.mrf.mxu1 }
  0x82   :  { %v95_v53 = vadd.f32 %v94_v27, %v2326_v34  ;;  %v124_v54 = vadd.f32 %v123_v28, %v2326_v34 }
  0x84   :  { %v541_v4 = vmax.f32 %v95_v53, 0.0  ;;  %v542_v5 = vmax.f32 %v124_v54, 0.0 }
  0x88   :  { %v152_v29 = vpop.f32.mrf.mxu2  ;;  %v181_v30 = vpop.f32.mrf.mxu3 }
  0x89   :  { %v97_v31 = vpop.f32.mrf.mxu0  ;;  %v126_v32 = vpop.f32.mrf.mxu1  ;;  %v153_v11 = vadd.f32 %v152_v29, %v2326_v34  ;;  %v182_v12 = vadd.f32 %v181_v30, %v2326_v34  ;;  %v2387_v29 = vld [vmem:[%s3686_s3 + $0x10] sm:$0xff] }
  0x8a   :  { %v98_v49 = vadd.f32 %v97_v31, %v2330_v40  ;;  %v127_v50 = vadd.f32 %v126_v32, %v2330_v40 }
  0x8b   :  { %v543_v19 = vmax.f32 %v153_v11, 0.0  ;;  %v544_v20 = vmax.f32 %v182_v12, 0.0 }
  0x8c   :  { %v557_v57 = vmax.f32 %v98_v49, 0.0  ;;  %v558_v58 = vmax.f32 %v127_v50, 0.0 }
  0x90   :  { %v155_v35 = vpop.f32.mrf.mxu2  ;;  %v184_v36 = vpop.f32.mrf.mxu3 }
  0x91   :  { %v100_v37 = vpop.f32.mrf.mxu0  ;;  %v129_v38 = vpop.f32.mrf.mxu1  ;;  %v156_v6 = vadd.f32 %v155_v35, %v2330_v40  ;;  %v185_v7 = vadd.f32 %v184_v36, %v2330_v40 }
  0x92   :  { %v101_v45 = vadd.f32 %v100_v37, %v2324_v33  ;;  %v130_v46 = vadd.f32 %v129_v38, %v2324_v33 }
  0x93   :  { %v559_v15 = vmax.f32 %v156_v6, 0.0  ;;  %v560_v16 = vmax.f32 %v185_v7, 0.0 }
  0x94   :  { %v573_v55 = vmax.f32 %v101_v45, 0.0  ;;  %v574_v56 = vmax.f32 %v130_v46, 0.0 }
  0x98   :  { %v158_v41 = vpop.f32.mrf.mxu2  ;;  %v187_v42 = vpop.f32.mrf.mxu3 }
  0x99   :  { %v103_v43 = vpop.f32.mrf.mxu0  ;;  %v132_v44 = vpop.f32.mrf.mxu1  ;;  %v159_v61 = vadd.f32 %v158_v41, %v2324_v33  ;;  %v188_v62 = vadd.f32 %v187_v42, %v2324_v33  ;;  %v2404_v42 = vld [vmem:[%s3686_s3 + $0x18] sm:$0xff] }
  0x9a   :  { %v104_v47 = vadd.f32 %v103_v43, %v2328_v39  ;;  %v133_v48 = vadd.f32 %v132_v44, %v2328_v39 }
  0x9b   :  { %v575_v13 = vmax.f32 %v159_v61, 0.0  ;;  %v576_v14 = vmax.f32 %v188_v62, 0.0 }
  0x9c   :  { %v589_v51 = vmax.f32 %v104_v47, 0.0  ;;  %v590_v52 = vmax.f32 %v133_v48, 0.0 }
  0x9e   :  { %658 = vmatpush.msra.mxu0 %v589_v51  ;;  %687 = vmatpush.msra.mxu1 %v590_v52 }
  0xa0   :  { %v161_v59 = vpop.f32.mrf.mxu2  ;;  %v190_v60 = vpop.f32.mrf.mxu3  ;;  %659 = vmatpush.msra.mxu0 %v573_v55  ;;  %688 = vmatpush.msra.mxu1 %v574_v56 }
  0xa1   :  { %v162_v63 = vadd.f32 %v161_v59, %v2328_v39  ;;  %v191_v0 = vadd.f32 %v190_v60, %v2328_v39  ;;  %v2344_v1 = vpop.f32.mrf.mxu0  ;;  %v2346_v2 = vpop.f32.mrf.mxu1 }
  0xa2   :  { %660 = vmatpush.msra.mxu0 %v557_v57  ;;  %689 = vmatpush.msra.mxu1 %v558_v58  ;;  %v211_v47 = vadd.f32 %v2344_v1, %v2326_v34  ;;  %v240_v48 = vadd.f32 %v2346_v2, %v2326_v34 }
  0xa3   :  { %v591_v8 = vmax.f32 %v162_v63, 0.0  ;;  %v592_v9 = vmax.f32 %v191_v0, 0.0 }
  0xa4   :  { %661 = vmatpush.msra.mxu0 %v541_v4  ;;  %690 = vmatpush.msra.mxu1 %v542_v5  ;;  %v545_v61 = vmax.f32 %v211_v47, 0.0  ;;  %v546_v62 = vmax.f32 %v240_v48, 0.0 }
  0xa5   :  { %716 = vmatpush.msra.mxu2 %v591_v8  ;;  %745 = vmatpush.msra.mxu3 %v592_v9 }
  0xa6   :  { %2010 = vmatmul.msk.f32.vlgmr.msra.gmra.mxu0 %vm633_vm1, %v2356_v10  ;;  %2014 = vmatmul.msk.f32.vlgmr.msra.gmra.mxu1 %vm633_vm1, %v2356_v10 }
  0xa7   :  { %717 = vmatpush.msra.mxu2 %v575_v13  ;;  %746 = vmatpush.msra.mxu3 %v576_v14 }
  0xa8   :  { %v2364_v17 = vpop.f32.mrf.mxu2  ;;  %v2366_v18 = vpop.f32.mrf.mxu3 }
  0xa9   :  { %718 = vmatpush.msra.mxu2 %v559_v15  ;;  %747 = vmatpush.msra.mxu3 %v560_v16  ;;  %v213_v21 = vpop.f32.mrf.mxu0  ;;  %v242_v22 = vpop.f32.mrf.mxu1  ;;  %v269_v3 = vadd.f32 %v2364_v17, %v2326_v34  ;;  %v298_v4 = vadd.f32 %v2366_v18, %v2326_v34 }
  0xaa   :  { %v214_v45 = vadd.f32 %v213_v21, %v2330_v40  ;;  %v243_v46 = vadd.f32 %v242_v22, %v2330_v40 }
  0xab   :  { %719 = vmatpush.msra.mxu2 %v543_v19  ;;  %748 = vmatpush.msra.mxu3 %v544_v20  ;;  %v547_v14 = vmax.f32 %v269_v3, 0.0  ;;  %v548_v15 = vmax.f32 %v298_v4, 0.0 }
  0xac   :  { %2018 = vmatmul.msk.f32.vlgmr.msra.gmra.mxu2 %vm633_vm1, %v2356_v10  ;;  %2022 = vmatmul.msk.f32.vlgmr.msra.gmra.mxu3 %vm633_vm1, %v2356_v10  ;;  %v561_v53 = vmax.f32 %v214_v45, 0.0  ;;  %v562_v54 = vmax.f32 %v243_v46, 0.0 }
  0xae   :  { %2011 = vmatmul.msk.f32.gmra.mxu0 %vm633_vm1, %v2374_v24  ;;  %2015 = vmatmul.msk.f32.gmra.mxu1 %vm633_vm1, %v2374_v24 }
  0xb0   :  { %v271_v25 = vpop.f32.mrf.mxu2  ;;  %v300_v26 = vpop.f32.mrf.mxu3 }
  0xb1   :  { %v216_v27 = vpop.f32.mrf.mxu0  ;;  %v245_v28 = vpop.f32.mrf.mxu1  ;;  %v272_v1 = vadd.f32 %v271_v25, %v2330_v40  ;;  %v301_v2 = vadd.f32 %v300_v26, %v2330_v40 }
  0xb2   :  { %v217_v38 = vadd.f32 %v216_v27, %v2324_v33  ;;  %v246_v41 = vadd.f32 %v245_v28, %v2324_v33 }
  0xb3   :  { %v563_v7 = vmax.f32 %v272_v1, 0.0  ;;  %v564_v8 = vmax.f32 %v301_v2, 0.0 }
  0xb4   :  { %2019 = vmatmul.msk.f32.gmra.mxu2 %vm633_vm1, %v2374_v24  ;;  %2023 = vmatmul.msk.f32.gmra.mxu3 %vm633_vm1, %v2374_v24  ;;  %v577_v49 = vmax.f32 %v217_v38, 0.0  ;;  %v578_v50 = vmax.f32 %v246_v41, 0.0 }
  0xb6   :  { %2012 = vmatmul.msk.f32.gmra.mxu0 %vm633_vm1, %v2387_v29  ;;  %2016 = vmatmul.msk.f32.gmra.mxu1 %vm633_vm1, %v2387_v29 }
  0xb8   :  { %v274_v30 = vpop.f32.mrf.mxu2  ;;  %v303_v31 = vpop.f32.mrf.mxu3 }
  0xb9   :  { %v219_v32 = vpop.f32.mrf.mxu0  ;;  %v248_v35 = vpop.f32.mrf.mxu1  ;;  %v275_v59 = vadd.f32 %v274_v30, %v2324_v33  ;;  %v304_v60 = vadd.f32 %v303_v31, %v2324_v33 }
  0xba   :  { %v220_v36 = vadd.f32 %v219_v32, %v2328_v39  ;;  %v249_v37 = vadd.f32 %v248_v35, %v2328_v39 }
  0xbb   :  { %v579_v5 = vmax.f32 %v275_v59, 0.0  ;;  %v580_v6 = vmax.f32 %v304_v60, 0.0 }
  0xbc   :  { %v593_v43 = vmax.f32 %v220_v36, 0.0  ;;  %v594_v44 = vmax.f32 %v249_v37, 0.0  ;;  %2020 = vmatmul.msk.f32.gmra.mxu2 %vm633_vm1, %v2387_v29  ;;  %2024 = vmatmul.msk.f32.gmra.mxu3 %vm633_vm1, %v2387_v29 }
  0xbe   :  { %2013 = vmatmul.msk.f32.gmra.mxu0 %vm633_vm1, %v2404_v42  ;;  %2017 = vmatmul.msk.f32.gmra.mxu1 %vm633_vm1, %v2404_v42 }
  0xbf   :  { %774 = vmatpush.msrb.mxu0 %v593_v43  ;;  %803 = vmatpush.msrb.mxu1 %v594_v44 }
  0xc0   :  { %v277_v51 = vpop.f32.mrf.mxu2  ;;  %v306_v52 = vpop.f32.mrf.mxu3 }
  0xc1   :  { %v278_v55 = vadd.f32 %v277_v51, %v2328_v39  ;;  %v307_v56 = vadd.f32 %v306_v52, %v2328_v39  ;;  %775 = vmatpush.msrb.mxu0 %v577_v49  ;;  %804 = vmatpush.msrb.mxu1 %v578_v50  ;;  %v2422_v57 = vpop.f32.mrf.mxu0  ;;  %v2424_v58 = vpop.f32.mrf.mxu1 }
  0xc2   :  { %v327_v36 = vadd.f32 %v2422_v57, %v2326_v34  ;;  %v356_v37 = vadd.f32 %v2424_v58, %v2326_v34 }
  0xc3   :  { %v595_v63 = vmax.f32 %v278_v55, 0.0  ;;  %v596_v0 = vmax.f32 %v307_v56, 0.0  ;;  %776 = vmatpush.msrb.mxu0 %v561_v53  ;;  %805 = vmatpush.msrb.mxu1 %v562_v54 }
  0xc4   :  { %2021 = vmatmul.msk.f32.gmra.mxu2 %vm633_vm1, %v2404_v42  ;;  %2025 = vmatmul.msk.f32.gmra.mxu3 %vm633_vm1, %v2404_v42  ;;  %v549_v51 = vmax.f32 %v327_v36, 0.0  ;;  %v550_v52 = vmax.f32 %v356_v37, 0.0 }
  0xc5   :  { %777 = vmatpush.msrb.mxu0 %v545_v61  ;;  %806 = vmatpush.msrb.mxu1 %v546_v62 }
  0xc6   :  { %832 = vmatpush.msrb.mxu2 %v595_v63  ;;  %861 = vmatpush.msrb.mxu3 %v596_v0 }
  0xc7   :  { %2026 = vmatmul.msk.f32.vlgmr.msrb.gmra.mxu0 %vm633_vm1, %v2356_v10  ;;  %2030 = vmatmul.msk.f32.vlgmr.msrb.gmra.mxu1 %vm633_vm1, %v2356_v10 }
  0xc8   :  { %833 = vmatpush.msrb.mxu2 %v579_v5  ;;  %862 = vmatpush.msrb.mxu3 %v580_v6  ;;  %v2442_v9 = vpop.f32.mrf.mxu2  ;;  %v2444_v11 = vpop.f32.mrf.mxu3 }
  0xc9   :  { %v329_v12 = vpop.f32.mrf.mxu0  ;;  %v358_v13 = vpop.f32.mrf.mxu1  ;;  %v385_v59 = vadd.f32 %v2442_v9, %v2326_v34  ;;  %v414_v60 = vadd.f32 %v2444_v11, %v2326_v34 }
  0xca   :  { %834 = vmatpush.msrb.mxu2 %v563_v7  ;;  %863 = vmatpush.msrb.mxu3 %v564_v8  ;;  %v330_v30 = vadd.f32 %v329_v12, %v2330_v40  ;;  %v359_v31 = vadd.f32 %v358_v13, %v2330_v40 }
  0xcb   :  { %v551_v5 = vmax.f32 %v385_v59, 0.0  ;;  %v552_v6 = vmax.f32 %v414_v60, 0.0 }
  0xcc   :  { %835 = vmatpush.msrb.mxu2 %v547_v14  ;;  %864 = vmatpush.msrb.mxu3 %v548_v15  ;;  %v565_v43 = vmax.f32 %v330_v30, 0.0  ;;  %v566_v44 = vmax.f32 %v359_v31, 0.0 }
  0xcd   :  { %2034 = vmatmul.msk.f32.vlgmr.msrb.gmra.mxu2 %vm633_vm1, %v2356_v10  ;;  %2038 = vmatmul.msk.f32.vlgmr.msrb.gmra.mxu3 %vm633_vm1, %v2356_v10 }
  0xcf   :  { %2027 = vmatmul.msk.f32.gmra.mxu0 %vm633_vm1, %v2374_v24  ;;  %2031 = vmatmul.msk.f32.gmra.mxu1 %vm633_vm1, %v2374_v24 }
  0xd0   :  { %v387_v16 = vpop.f32.mrf.mxu2  ;;  %v416_v17 = vpop.f32.mrf.mxu3 }
  0xd1   :  { %v332_v18 = vpop.f32.mrf.mxu0  ;;  %v361_v19 = vpop.f32.mrf.mxu1  ;;  %v388_v57 = vadd.f32 %v387_v16, %v2330_v40  ;;  %v417_v58 = vadd.f32 %v416_v17, %v2330_v40 }
  0xd2   :  { %v333_v25 = vadd.f32 %v332_v18, %v2324_v33  ;;  %v362_v26 = vadd.f32 %v361_v19, %v2324_v33 }
  0xd3   :  { %v567_v63 = vmax.f32 %v388_v57, 0.0  ;;  %v568_v0 = vmax.f32 %v417_v58, 0.0 }
  0xd4   :  { %v581_v38 = vmax.f32 %v333_v25, 0.0  ;;  %v582_v41 = vmax.f32 %v362_v26, 0.0 }
  0xd5   :  { %2035 = vmatmul.msk.f32.gmra.mxu2 %vm633_vm1, %v2374_v24  ;;  %2039 = vmatmul.msk.f32.gmra.mxu3 %vm633_vm1, %v2374_v24 }
  0xd7   :  { %2028 = vmatmul.msk.f32.gmra.mxu0 %vm633_vm1, %v2387_v29  ;;  %2032 = vmatmul.msk.f32.gmra.mxu1 %vm633_vm1, %v2387_v29 }
  0xd8   :  { %v390_v20 = vpop.f32.mrf.mxu2  ;;  %v419_v21 = vpop.f32.mrf.mxu3 }
  0xd9   :  { %v335_v22 = vpop.f32.mrf.mxu0  ;;  %v364_v23 = vpop.f32.mrf.mxu1  ;;  %v391_v53 = vadd.f32 %v390_v20, %v2324_v33  ;;  %v420_v54 = vadd.f32 %v419_v21, %v2324_v33 }
  0xda   :  { %v336_v27 = vadd.f32 %v335_v22, %v2328_v39  ;;  %v365_v28 = vadd.f32 %v364_v23, %v2328_v39 }
  0xdb   :  { %v583_v61 = vmax.f32 %v391_v53, 0.0  ;;  %v584_v62 = vmax.f32 %v420_v54, 0.0 }
  0xdc   :  { %v597_v32 = vmax.f32 %v336_v27, 0.0  ;;  %v598_v35 = vmax.f32 %v365_v28, 0.0 }
  0xdd   :  { %2036 = vmatmul.msk.f32.gmra.mxu2 %vm633_vm1, %v2387_v29  ;;  %2040 = vmatmul.msk.f32.gmra.mxu3 %vm633_vm1, %v2387_v29 }
  0xde   :  { %890 = vmatpush.msra.mxu0 %v597_v32  ;;  %919 = vmatpush.msra.mxu1 %v598_v35 }
  0xdf   :  { %2029 = vmatmul.msk.f32.gmra.mxu0 %vm633_vm1, %v2404_v42  ;;  %2033 = vmatmul.msk.f32.gmra.mxu1 %vm633_vm1, %v2404_v42 }
  0xe0   :  { %v393_v45 = vpop.f32.mrf.mxu2  ;;  %v422_v46 = vpop.f32.mrf.mxu3  ;;  %891 = vmatpush.msra.mxu0 %v581_v38  ;;  %920 = vmatpush.msra.mxu1 %v582_v41 }
  0xe1   :  { %v394_v47 = vadd.f32 %v393_v45, %v2328_v39  ;;  %v423_v48 = vadd.f32 %v422_v46, %v2328_v39  ;;  %v2482_v49 = vpop.f32.mrf.mxu0  ;;  %v2484_v50 = vpop.f32.mrf.mxu1 }
  0xe2   :  { %892 = vmatpush.msra.mxu0 %v565_v43  ;;  %921 = vmatpush.msra.mxu1 %v566_v44  ;;  %v443_v25 = vadd.f32 %v2482_v49, %v2326_v34  ;;  %v472_v26 = vadd.f32 %v2484_v50, %v2326_v34 }
  0xe3   :  { %v599_v55 = vmax.f32 %v394_v47, 0.0  ;;  %v600_v56 = vmax.f32 %v423_v48, 0.0 }
  0xe4   :  { %893 = vmatpush.msra.mxu0 %v549_v51  ;;  %922 = vmatpush.msra.mxu1 %v550_v52  ;;  %v553_v38 = vmax.f32 %v443_v25, 0.0  ;;  %v554_v41 = vmax.f32 %v472_v26, 0.0 }
  0xe5   :  { %2037 = vmatmul.msk.f32.gmra.mxu2 %vm633_vm1, %v2404_v42  ;;  %2041 = vmatmul.msk.f32.gmra.mxu3 %vm633_vm1, %v2404_v42 }
  0xe6   :  { %948 = vmatpush.msra.mxu2 %v599_v55  ;;  %977 = vmatpush.msra.mxu3 %v600_v56 }
  0xe7   :  { %2042 = vmatmul.msk.f32.vlgmr.msra.gmra.mxu0 %vm633_vm1, %v2356_v10  ;;  %2046 = vmatmul.msk.f32.vlgmr.msra.gmra.mxu1 %vm633_vm1, %v2356_v10 }
  0xe8   :  { %949 = vmatpush.msra.mxu2 %v583_v61  ;;  %978 = vmatpush.msra.mxu3 %v584_v62  ;;  %v2502_v1 = vpop.f32.mrf.mxu2  ;;  %v2504_v2 = vpop.f32.mrf.mxu3 }
  0xe9   :  { %v445_v3 = vpop.f32.mrf.mxu0  ;;  %v474_v4 = vpop.f32.mrf.mxu1 }
  0xea   :  { %950 = vmatpush.msra.mxu2 %v567_v63  ;;  %979 = vmatpush.msra.mxu3 %v568_v0  ;;  %v446_v20 = vadd.f32 %v445_v3, %v2330_v40  ;;  %v475_v21 = vadd.f32 %v474_v4, %v2330_v40 }
  0xec   :  { %951 = vmatpush.msra.mxu2 %v551_v5  ;;  %980 = vmatpush.msra.mxu3 %v552_v6  ;;  %v569_v30 = vmax.f32 %v446_v20, 0.0  ;;  %v570_v31 = vmax.f32 %v475_v21, 0.0 }
  0xed   :  { %2050 = vmatmul.msk.f32.vlgmr.msra.gmra.mxu2 %vm633_vm1, %v2356_v10  ;;  %2054 = vmatmul.msk.f32.vlgmr.msra.gmra.mxu3 %vm633_vm1, %v2356_v10 }
  0xef   :  { %2043 = vmatmul.msk.f32.gmra.mxu0 %vm633_vm1, %v2374_v24  ;;  %2047 = vmatmul.msk.f32.gmra.mxu1 %vm633_vm1, %v2374_v24 }
  0xf0   :  { %v503_v7 = vpop.f32.mrf.mxu2  ;;  %v532_v8 = vpop.f32.mrf.mxu3 }
  0xf1   :  { %v448_v9 = vpop.f32.mrf.mxu0  ;;  %v477_v11 = vpop.f32.mrf.mxu1  ;;  %v504_v47 = vadd.f32 %v503_v7, %v2330_v40  ;;  %v533_v48 = vadd.f32 %v532_v8, %v2330_v40 }
  0xf2   :  { %v449_v16 = vadd.f32 %v448_v9, %v2324_v33  ;;  %v478_v17 = vadd.f32 %v477_v11, %v2324_v33 }
  0xf3   :  { %v571_v40 = vmax.f32 %v504_v47, 0.0  ;;  %v572_v51 = vmax.f32 %v533_v48, 0.0 }
  0xf4   :  { %v585_v27 = vmax.f32 %v449_v16, 0.0  ;;  %v586_v28 = vmax.f32 %v478_v17, 0.0 }
  0xf5   :  { %2051 = vmatmul.msk.f32.gmra.mxu2 %vm633_vm1, %v2374_v24  ;;  %2055 = vmatmul.msk.f32.gmra.mxu3 %vm633_vm1, %v2374_v24 }
  0xf7   :  { %2044 = vmatmul.msk.f32.gmra.mxu0 %vm633_vm1, %v2387_v29  ;;  %2048 = vmatmul.msk.f32.gmra.mxu1 %vm633_vm1, %v2387_v29 }
  0xf8   :  { %v506_v12 = vpop.f32.mrf.mxu2  ;;  %v535_v13 = vpop.f32.mrf.mxu3 }
  0xf9   :  { %v451_v14 = vpop.f32.mrf.mxu0  ;;  %v480_v15 = vpop.f32.mrf.mxu1  ;;  %v507_v43 = vadd.f32 %v506_v12, %v2324_v33  ;;  %v536_v44 = vadd.f32 %v535_v13, %v2324_v33  ;;  %v530_v33 = vadd.f32 %v2504_v2, %v2326_v34 }
  0xfa   :  { %v452_v18 = vadd.f32 %v451_v14, %v2328_v39  ;;  %v481_v19 = vadd.f32 %v480_v15, %v2328_v39  ;;  %v2600_v12 = vpop.permute.xlu1 %630 }
  0xfb   :  { %v587_v49 = vmax.f32 %v507_v43, 0.0  ;;  %v588_v50 = vmax.f32 %v536_v44, 0.0  ;;  %v556_v53 = vmax.f32 %v530_v33, 0.0 }
  0xfc   :  { %v601_v22 = vmax.f32 %v452_v18, 0.0  ;;  %v602_v23 = vmax.f32 %v481_v19, 0.0 }
  0xfd   :  { %2052 = vmatmul.msk.f32.gmra.mxu2 %vm633_vm1, %v2387_v29  ;;  %2056 = vmatmul.msk.f32.gmra.mxu3 %vm633_vm1, %v2387_v29 }
  0xfe   :  { %1006 = vmatpush.msrb.mxu0 %v601_v22  ;;  %1035 = vmatpush.msrb.mxu1 %v602_v23 }
  0xff   :  { %2045 = vmatmul.msk.f32.gmra.mxu0 %vm633_vm1, %v2404_v42  ;;  %2049 = vmatmul.msk.f32.gmra.mxu1 %vm633_vm1, %v2404_v42 }
 0x100   :  { %v509_v32 = vpop.f32.mrf.mxu2  ;;  %v538_v35 = vpop.f32.mrf.mxu3  ;;  %1007 = vmatpush.msrb.mxu0 %v585_v27  ;;  %1036 = vmatpush.msrb.mxu1 %v586_v28 }
 0x101   :  { %v510_v36 = vadd.f32 %v509_v32, %v2328_v39  ;;  %v539_v37 = vadd.f32 %v538_v35, %v2328_v39  ;;  %v501_v39 = vadd.f32 %v2502_v1, %v2326_v34  ;;  %v2582_v34 = vpop.permute.xlu2 %615 }
 0x102   :  { %1008 = vmatpush.msrb.mxu0 %v569_v30  ;;  %1037 = vmatpush.msrb.mxu1 %v570_v31 }
 0x103   :  { %v603_v45 = vmax.f32 %v510_v36, 0.0  ;;  %v604_v46 = vmax.f32 %v539_v37, 0.0  ;;  %v555_v52 = vmax.f32 %v501_v39, 0.0 }
 0x104   :  { %1009 = vmatpush.msrb.mxu0 %v553_v38  ;;  %1038 = vmatpush.msrb.mxu1 %v554_v41 }
 0x105   :  { %2053 = vmatmul.msk.f32.gmra.mxu2 %vm633_vm1, %v2404_v42  ;;  %2057 = vmatmul.msk.f32.gmra.mxu3 %vm633_vm1, %v2404_v42 }
 0x106   :  { %1064 = vmatpush.msrb.mxu2 %v603_v45  ;;  %1093 = vmatpush.msrb.mxu3 %v604_v46 }
 0x107   :  { %2058 = vmatmul.msk.f32.vlgmr.msrb.gmra.mxu0 %vm633_vm1, %v2356_v10  ;;  %2062 = vmatmul.msk.f32.vlgmr.msrb.gmra.mxu1 %vm633_vm1, %v2356_v10 }
 0x108   :  { %1065 = vmatpush.msrb.mxu2 %v587_v49  ;;  %1094 = vmatpush.msrb.mxu3 %v588_v50 }
 0x109   :  { %v2590_v57 = vpop.permute.xlu2 %620 }
 0x10a   :  { %1066 = vmatpush.msrb.mxu2 %v571_v40  ;;  %1095 = vmatpush.msrb.mxu3 %v572_v51 }
 0x10c   :  { %1067 = vmatpush.msrb.mxu2 %v555_v52  ;;  %1096 = vmatpush.msrb.mxu3 %v556_v53 }
 0x10d   :  { %2066 = vmatmul.msk.f32.vlgmr.msrb.gmra.mxu2 %vm633_vm1, %v2356_v10  ;;  %2070 = vmatmul.msk.f32.vlgmr.msrb.gmra.mxu3 %vm633_vm1, %v2356_v10 }
 0x10f   :  { %2059 = vmatmul.msk.f32.gmra.mxu0 %vm633_vm1, %v2374_v24  ;;  %2063 = vmatmul.msk.f32.gmra.mxu1 %vm633_vm1, %v2374_v24 }
 0x115   :  { %2067 = vmatmul.msk.f32.gmra.mxu2 %vm633_vm1, %v2374_v24  ;;  %2071 = vmatmul.msk.f32.gmra.mxu3 %vm633_vm1, %v2374_v24 }
 0x117   :  { %2060 = vmatmul.msk.f32.gmra.mxu0 %vm633_vm1, %v2387_v29  ;;  %2064 = vmatmul.msk.f32.gmra.mxu1 %vm633_vm1, %v2387_v29 }
 0x11d   :  { %2068 = vmatmul.msk.f32.gmra.mxu2 %vm633_vm1, %v2387_v29  ;;  %2072 = vmatmul.msk.f32.gmra.mxu3 %vm633_vm1, %v2387_v29 }
 0x11f   :  { %2061 = vmatmul.msk.f32.gmra.mxu0 %vm633_vm1, %v2404_v42  ;;  %2065 = vmatmul.msk.f32.gmra.mxu1 %vm633_vm1, %v2404_v42 }
 0x123   :  { %v663_v10 = vpop.f32.mrf.mxu0  ;;  %v692_v24 = vpop.f32.mrf.mxu1 }
 0x124   :  { %v664_v54 = vadd.f32 %v663_v10, %v2582_v34  ;;  %v693_v55 = vadd.f32 %v692_v24, %v2582_v34 }
 0x125   :  { %2069 = vmatmul.msk.f32.gmra.mxu2 %vm633_vm1, %v2404_v42  ;;  %2073 = vmatmul.msk.f32.gmra.mxu3 %vm633_vm1, %v2404_v42  ;;  %v2595_v42 = vpop.permute.xlu0 %625 }
 0x126   :  { %v1110_v29 = vmax.f32 %v664_v54, 0.0  ;;  %v1111_v56 = vmax.f32 %v693_v55, 0.0 }
 0x128   :  { %1206 = vxpose.xlu0.b32.start [1/4] (short) %v1111_v56, 128  ;;  %1174 = vxpose.xlu2.b32.start [1/4] (short) %v1110_v29, 128 }
 0x12b   :  { %v666_v58 = vpop.f32.mrf.mxu0  ;;  %v695_v59 = vpop.f32.mrf.mxu1 }
 0x12c   :  { %v667_v60 = vadd.f32 %v666_v58, %v2590_v57  ;;  %v696_v61 = vadd.f32 %v695_v59, %v2590_v57 }
 0x12e   :  { %v1126_v62 = vmax.f32 %v667_v60, 0.0  ;;  %v1127_v63 = vmax.f32 %v696_v61, 0.0 }
 0x12f   :  { %v721_v0 = vpop.f32.mrf.mxu2  ;;  %v750_v27 = vpop.f32.mrf.mxu3 }
 0x130   :  { %v722_v1 = vadd.f32 %v721_v0, %v2582_v34  ;;  %1207 = vxpose.xlu0.b32.cont [2/4] (short) %v1127_v63, 128  ;;  %1175 = vxpose.xlu2.b32.cont [2/4] (short) %v1126_v62, 128  ;;  %v751_v30 = vadd.f32 %v750_v27, %v2582_v34 }
 0x132   :  { %v1112_v2 = vmax.f32 %v722_v1, 0.0  ;;  %v1113_v37 = vmax.f32 %v751_v30, 0.0 }
 0x133   :  { %v669_v3 = vpop.f32.mrf.mxu0  ;;  %v698_v4 = vpop.f32.mrf.mxu1 }
 0x134   :  { %v670_v5 = vadd.f32 %v669_v3, %v2595_v42  ;;  %v699_v6 = vadd.f32 %v698_v4, %v2595_v42  ;;  %1238 = vxpose.xlu1.b32.start [1/4] (short) %v1112_v2, 128 }
 0x136   :  { %v1142_v7 = vmax.f32 %v670_v5, 0.0  ;;  %v1143_v8 = vmax.f32 %v699_v6, 0.0 }
 0x137   :  { %v724_v9 = vpop.f32.mrf.mxu2  ;;  %v753_v32 = vpop.f32.mrf.mxu3 }
 0x138   :  { %v725_v11 = vadd.f32 %v724_v9, %v2590_v57  ;;  %1208 = vxpose.xlu0.b32.cont [3/4] (short) %v1143_v8, 128  ;;  %1176 = vxpose.xlu2.b32.cont [3/4] (short) %v1142_v7, 128  ;;  %v754_v41 = vadd.f32 %v753_v32, %v2590_v57 }
 0x13a   :  { %v1128_v13 = vmax.f32 %v725_v11, 0.0  ;;  %v1129_v46 = vmax.f32 %v754_v41, 0.0 }
 0x13b   :  { %v672_v14 = vpop.f32.mrf.mxu0  ;;  %v701_v15 = vpop.f32.mrf.mxu1 }
 0x13c   :  { %v673_v16 = vadd.f32 %v672_v14, %v2600_v12  ;;  %v702_v17 = vadd.f32 %v701_v15, %v2600_v12  ;;  %1239 = vxpose.xlu1.b32.cont [2/4] (short) %v1128_v13, 128 }
 0x13e   :  { %v1158_v18 = vmax.f32 %v673_v16, 0.0  ;;  %v1159_v19 = vmax.f32 %v702_v17, 0.0 }
 0x13f   :  { %v727_v20 = vpop.f32.mrf.mxu2  ;;  %v756_v44 = vpop.f32.mrf.mxu3 }
 0x140   :  { %v728_v21 = vadd.f32 %v727_v20, %v2595_v42  ;;  %1209 = vxpose.xlu0.b32.end [4/4] (short) %v1159_v19, 128  ;;  %1177 = vxpose.xlu2.b32.end [4/4] (short) %v1158_v18, 128  ;;  %v757_v33 = vadd.f32 %v756_v44, %v2595_v42 }
 0x142   :  { %v1144_v22 = vmax.f32 %v728_v21, 0.0  ;;  %v1145_v40 = vmax.f32 %v757_v33, 0.0 }
 0x144   :  { %1240 = vxpose.xlu1.b32.cont [3/4] (short) %v1144_v22, 128  ;;  %v779_v28 = vpop.f32.mrf.mxu0  ;;  %v808_v36 = vpop.f32.mrf.mxu1 }
 0x145   :  { %v780_v31 = vadd.f32 %v779_v28, %v2582_v34  ;;  %v809_v47 = vadd.f32 %v808_v36, %v2582_v34 }
 0x147   :  { %v730_v23 = vpop.f32.mrf.mxu2  ;;  %v1114_v38 = vmax.f32 %v780_v31, 0.0  ;;  %v1115_v49 = vmax.f32 %v809_v47, 0.0  ;;  %v759_v53 = vpop.f32.mrf.mxu3 }
 0x148   :  { %v731_v25 = vadd.f32 %v730_v23, %v2600_v12  ;;  %v760_v54 = vadd.f32 %v759_v53, %v2600_v12 }
 0x14a   :  { %v1160_v26 = vmax.f32 %v731_v25, 0.0  ;;  %v1161_v56 = vmax.f32 %v760_v54, 0.0 }
 0x14c   :  { %1241 = vxpose.xlu1.b32.end [4/4] (short) %v1160_v26, 128  ;;  %v782_v35 = vpop.f32.mrf.mxu0  ;;  %v811_v39 = vpop.f32.mrf.mxu1 }
 0x14d   :  { %v783_v43 = vadd.f32 %v782_v35, %v2590_v57  ;;  %v812_v51 = vadd.f32 %v811_v39, %v2590_v57 }
 0x14f   :  { %v1130_v48 = vmax.f32 %v783_v43, 0.0  ;;  %v1131_v55 = vmax.f32 %v812_v51, 0.0 }
 0x150   :  { %v837_v14 = vpop.f32.mrf.mxu2  ;;  %v866_v15 = vpop.f32.mrf.mxu3 }
 0x151   :  { %v838_v20 = vadd.f32 %v837_v14, %v2582_v34  ;;  %v867_v21 = vadd.f32 %v866_v15, %v2582_v34 }
 0x153   :  { %v1116_v27 = vmax.f32 %v838_v20, 0.0  ;;  %v1117_v28 = vmax.f32 %v867_v21, 0.0 }
 0x154   :  { %v785_v45 = vpop.f32.mrf.mxu0  ;;  %v814_v24 = vpop.f32.mrf.mxu1 }
 0x155   :  { %v786_v50 = vadd.f32 %v785_v45, %v2595_v42  ;;  %v815_v58 = vadd.f32 %v814_v24, %v2595_v42 }
 0x157   :  { %v1146_v52 = vmax.f32 %v786_v50, 0.0  ;;  %v1147_v61 = vmax.f32 %v815_v58, 0.0 }
 0x158   :  { %v840_v22 = vpop.f32.mrf.mxu2  ;;  %v869_v23 = vpop.f32.mrf.mxu3 }
 0x159   :  { %v841_v32 = vadd.f32 %v840_v22, %v2590_v57  ;;  %v870_v35 = vadd.f32 %v869_v23, %v2590_v57 }
 0x15b   :  { %v1132_v41 = vmax.f32 %v841_v32, 0.0  ;;  %v1133_v43 = vmax.f32 %v870_v35, 0.0 }
 0x15c   :  { %v788_v10 = vpop.f32.mrf.mxu0  ;;  %v817_v62 = vpop.f32.mrf.mxu1 }
 0x15d   :  { %v789_v29 = vadd.f32 %v788_v10, %v2600_v12  ;;  %v818_v63 = vadd.f32 %v817_v62, %v2600_v12 }
 0x15f   :  { %v1162_v59 = vmax.f32 %v789_v29, 0.0  ;;  %v1163_v1 = vmax.f32 %v818_v63, 0.0 }
 0x164   :  { %v895_v26 = vpop.f32.mrf.mxu0 }
 0x165   :  { %v896_v44 = vadd.f32 %v895_v26, %v2582_v34 }
 0x167   :  { %v1118_v33 = vmax.f32 %v896_v44, 0.0 }
 0x16c   :  { %v898_v45 = vpop.f32.mrf.mxu0 }
 0x16d   :  { %v899_v51 = vadd.f32 %v898_v45, %v2590_v57 }
 0x174   :  { %v901_v24 = vpop.f32.mrf.mxu0 }
 0x1a8   :  { %1302 = vxpose.xlu0.b32.start [1/4] (short) %v1114_v38, 128  ;;  %1270 = vxpose.xlu2.b32.start [1/4] (short) %v1113_v37, 128  ;;  %v843_v37 = vpop.f32.mrf.mxu2  ;;  %v872_v38 = vpop.f32.mrf.mxu3 }
 0x1a9   :  { %v873_v39 = vadd.f32 %v872_v38, %v2595_v42 }
 0x1b0   :  { %1303 = vxpose.xlu0.b32.cont [2/4] (short) %v1130_v48, 128  ;;  %1271 = vxpose.xlu2.b32.cont [2/4] (short) %v1129_v46, 128  ;;  %v844_v48 = vadd.f32 %v843_v37, %v2595_v42  ;;  %v875_v53 = vpop.f32.mrf.mxu3 }
 0x1b1   :  { %v876_v29 = vadd.f32 %v875_v53, %v2600_v12 }
 0x1b2   :  { %v1148_v50 = vmax.f32 %v844_v48, 0.0 }
 0x1b4   :  { %1334 = vxpose.xlu1.b32.start [1/4] (short) %v1115_v49, 128 }
 0x1b8   :  { %1304 = vxpose.xlu0.b32.cont [3/4] (short) %v1146_v52, 128  ;;  %1272 = vxpose.xlu2.b32.cont [3/4] (short) %v1145_v40, 128  ;;  %v1149_v40 = vmax.f32 %v873_v39, 0.0  ;;  %v846_v52 = vpop.f32.mrf.mxu2 }
 0x1bc   :  { %1335 = vxpose.xlu1.b32.cont [2/4] (short) %v1131_v55, 128  ;;  %v847_v55 = vadd.f32 %v846_v52, %v2600_v12  ;;  %v982_v52 = vpop.f32.mrf.mxu3 }
 0x1c0   :  { %1305 = vxpose.xlu0.b32.end [4/4] (short) %v1162_v59, 128  ;;  %1273 = vxpose.xlu2.b32.end [4/4] (short) %v1161_v56, 128  ;;  %v1134_v56 = vmax.f32 %v899_v51, 0.0  ;;  %v1164_v59 = vmax.f32 %v847_v55, 0.0 }
 0x1c1   :  { %v1190_v60 = vpop.trf.xlu2 }
 0x1c2   :  { %1686 = vst.msk [vmem:[%s3687_s5] sm:$0xff] %vm633_vm1, %v1190_v60  ;;  %v1165_v60 = vmax.f32 %v876_v29, 0.0 }
 0x1c4   :  { %1336 = vxpose.xlu1.b32.cont [3/4] (short) %v1147_v61, 128  ;;  %v902_v61 = vadd.f32 %v901_v24, %v2595_v42 }
 0x1c9   :  { %v1191_v0 = vpop.trf.xlu2 }
 0x1ca   :  { %1687 = vst.msk [vmem:[%s3687_s5 + $0x8] sm:$0xff] %vm633_vm1, %v1191_v0  ;;  %v1150_v0 = vmax.f32 %v902_v61, 0.0  ;;  %v983_v61 = vadd.f32 %v982_v52, %v2582_v34 }
 0x1cc   :  { %1337 = vxpose.xlu1.b32.end [4/4] (short) %v1163_v1, 128  ;;  %v1222_v13 = vpop.trf.xlu0  ;;  %v904_v1 = vpop.f32.mrf.mxu0 }
 0x1cd   :  { %1702 = vst.msk [vmem:[%s3687_s5 + $0x80] sm:$0xff] %vm633_vm1, %v1222_v13 }
 0x1d1   :  { %v1192_v2 = vpop.trf.xlu2 }
 0x1d2   :  { %1688 = vst.msk [vmem:[%s3687_s5 + $0x10] sm:$0xff] %vm633_vm1, %v1192_v2 }
 0x1d4   :  { %v1223_v17 = vpop.trf.xlu0 }
 0x1d5   :  { %1703 = vst.msk [vmem:[%s3687_s5 + $0x88] sm:$0xff] %vm633_vm1, %v1223_v17 }
 0x1d8   :  { %v1254_v18 = vpop.trf.xlu1 }
 0x1d9   :  { %v1193_v3 = vpop.trf.xlu2  ;;  %1718 = vst.msk [vmem:[%s3687_s5 + $0x100] sm:$0xff] %vm633_vm1, %v1254_v18 }
 0x1da   :  { %1689 = vst.msk [vmem:[%s3687_s5 + $0x18] sm:$0xff] %vm633_vm1, %v1193_v3  ;;  %v905_v3 = vadd.f32 %v904_v1, %v2600_v12 }
 0x1dc   :  { %v1224_v25 = vpop.trf.xlu0 }
 0x1dd   :  { %1704 = vst.msk [vmem:[%s3687_s5 + $0x90] sm:$0xff] %vm633_vm1, %v1224_v25 }
 0x1e0   :  { %v1255_v30 = vpop.trf.xlu1 }
 0x1e1   :  { %v1194_v4 = vpop.trf.xlu2  ;;  %1719 = vst.msk [vmem:[%s3687_s5 + $0x108] sm:$0xff] %vm633_vm1, %v1255_v30 }
 0x1e2   :  { %1690 = vst.msk [vmem:[%s3687_s5 + $0x20] sm:$0xff] %vm633_vm1, %v1194_v4 }
 0x1e4   :  { %v1225_v36 = vpop.trf.xlu0 }
 0x1e5   :  { %1705 = vst.msk [vmem:[%s3687_s5 + $0x98] sm:$0xff] %vm633_vm1, %v1225_v36 }
 0x1e8   :  { %v1256_v46 = vpop.trf.xlu1 }
 0x1e9   :  { %v1195_v5 = vpop.trf.xlu2  ;;  %1720 = vst.msk [vmem:[%s3687_s5 + $0x110] sm:$0xff] %vm633_vm1, %v1256_v46  ;;  %v953_v46 = vpop.f32.mrf.mxu2 }
 0x1ea   :  { %1691 = vst.msk [vmem:[%s3687_s5 + $0x28] sm:$0xff] %vm633_vm1, %v1195_v5 }
 0x1ec   :  { %v1226_v49 = vpop.trf.xlu0 }
 0x1ed   :  { %1706 = vst.msk [vmem:[%s3687_s5 + $0xa0] sm:$0xff] %vm633_vm1, %v1226_v49 }
 0x1f0   :  { %v1257_v10 = vpop.trf.xlu1 }
 0x1f1   :  { %v1196_v6 = vpop.trf.xlu2  ;;  %1721 = vst.msk [vmem:[%s3687_s5 + $0x118] sm:$0xff] %vm633_vm1, %v1257_v10  ;;  %v956_v51 = vpop.f32.mrf.mxu2 }
 0x1f2   :  { %1692 = vst.msk [vmem:[%s3687_s5 + $0x30] sm:$0xff] %vm633_vm1, %v1196_v6  ;;  %v1166_v6 = vmax.f32 %v905_v3, 0.0  ;;  %v1121_v3 = vmax.f32 %v983_v61, 0.0  ;;  %v1011_v61 = vpop.f32.mrf.mxu0 }
 0x1f4   :  { %v1227_v58 = vpop.trf.xlu0 }
 0x1f5   :  { %1707 = vst.msk [vmem:[%s3687_s5 + $0xa8] sm:$0xff] %vm633_vm1, %v1227_v58 }
 0x1f8   :  { %v1258_v62 = vpop.trf.xlu1 }
 0x1f9   :  { %v1197_v7 = vpop.trf.xlu2  ;;  %1722 = vst.msk [vmem:[%s3687_s5 + $0x120] sm:$0xff] %vm633_vm1, %v1258_v62 }
 0x1fa   :  { %1693 = vst.msk [vmem:[%s3687_s5 + $0x38] sm:$0xff] %vm633_vm1, %v1197_v7 }
 0x1fc   :  { %v1228_v2 = vpop.trf.xlu0 }
 0x1fd   :  { %1708 = vst.msk [vmem:[%s3687_s5 + $0xb0] sm:$0xff] %vm633_vm1, %v1228_v2 }
 0x200   :  { %v1259_v4 = vpop.trf.xlu1 }
 0x201   :  { %v1198_v8 = vpop.trf.xlu2  ;;  %1723 = vst.msk [vmem:[%s3687_s5 + $0x128] sm:$0xff] %vm633_vm1, %v1259_v4 }
 0x202   :  { %1694 = vst.msk [vmem:[%s3687_s5 + $0x40] sm:$0xff] %vm633_vm1, %v1198_v8 }
 0x204   :  { %v1229_v7 = vpop.trf.xlu0 }
 0x205   :  { %1709 = vst.msk [vmem:[%s3687_s5 + $0xb8] sm:$0xff] %vm633_vm1, %v1229_v7 }
 0x208   :  { %v1260_v8 = vpop.trf.xlu1 }
 0x209   :  { %v1199_v9 = vpop.trf.xlu2  ;;  %1724 = vst.msk [vmem:[%s3687_s5 + $0x130] sm:$0xff] %vm633_vm1, %v1260_v8 }
 0x20a   :  { %1695 = vst.msk [vmem:[%s3687_s5 + $0x48] sm:$0xff] %vm633_vm1, %v1199_v9 }
 0x210   :  { %v1261_v13 = vpop.trf.xlu1 }
 0x211   :  { %v1200_v11 = vpop.trf.xlu2  ;;  %1725 = vst.msk [vmem:[%s3687_s5 + $0x138] sm:$0xff] %vm633_vm1, %v1261_v13 }
 0x212   :  { %1696 = vst.msk [vmem:[%s3687_s5 + $0x50] sm:$0xff] %vm633_vm1, %v1200_v11  ;;  %v1230_v11 = vpop.trf.xlu0 }
 0x213   :  { %1710 = vst.msk [vmem:[%s3687_s5 + $0xc0] sm:$0xff] %vm633_vm1, %v1230_v11 }
 0x219   :  { %v1201_v16 = vpop.trf.xlu2 }
 0x21a   :  { %1697 = vst.msk [vmem:[%s3687_s5 + $0x58] sm:$0xff] %vm633_vm1, %v1201_v16  ;;  %v1231_v15 = vpop.trf.xlu0  ;;  %v1262_v16 = vpop.trf.xlu1 }
 0x21b   :  { %1711 = vst.msk [vmem:[%s3687_s5 + $0xc8] sm:$0xff] %vm633_vm1, %v1231_v15 }
 0x21c   :  { %1726 = vst.msk [vmem:[%s3687_s5 + $0x140] sm:$0xff] %vm633_vm1, %v1262_v16 }
 0x221   :  { %v1202_v19 = vpop.trf.xlu2 }
 0x222   :  { %1698 = vst.msk [vmem:[%s3687_s5 + $0x60] sm:$0xff] %vm633_vm1, %v1202_v19  ;;  %v1232_v18 = vpop.trf.xlu0  ;;  %v1263_v19 = vpop.trf.xlu1 }
 0x223   :  { %1712 = vst.msk [vmem:[%s3687_s5 + $0xd0] sm:$0xff] %vm633_vm1, %v1232_v18 }
 0x224   :  { %1727 = vst.msk [vmem:[%s3687_s5 + $0x148] sm:$0xff] %vm633_vm1, %v1263_v19 }
 0x228   :  { %1398 = vxpose.xlu0.b32.start [1/4] (short) %v1117_v28, 128  ;;  %1366 = vxpose.xlu2.b32.start [1/4] (short) %v1116_v27, 128 }
 0x229   :  { %v1203_v31 = vpop.trf.xlu2 }
 0x22a   :  { %1699 = vst.msk [vmem:[%s3687_s5 + $0x68] sm:$0xff] %vm633_vm1, %v1203_v31  ;;  %v1233_v21 = vpop.trf.xlu0  ;;  %v1264_v22 = vpop.trf.xlu1 }
 0x22b   :  { %1713 = vst.msk [vmem:[%s3687_s5 + $0xd8] sm:$0xff] %vm633_vm1, %v1233_v21 }
 0x22c   :  { %1728 = vst.msk [vmem:[%s3687_s5 + $0x150] sm:$0xff] %vm633_vm1, %v1264_v22 }
 0x230   :  { %1399 = vxpose.xlu0.b32.cont [2/4] (short) %v1133_v43, 128  ;;  %1367 = vxpose.xlu2.b32.cont [2/4] (short) %v1132_v41, 128  ;;  %v924_v43 = vpop.f32.mrf.mxu1 }
 0x231   :  { %v1204_v47 = vpop.trf.xlu2  ;;  %v925_v49 = vadd.f32 %v924_v43, %v2582_v34 }
 0x232   :  { %1700 = vst.msk [vmem:[%s3687_s5 + $0x70] sm:$0xff] %vm633_vm1, %v1204_v47  ;;  %v1234_v25 = vpop.trf.xlu0  ;;  %v1265_v26 = vpop.trf.xlu1 }
 0x233   :  { %1714 = vst.msk [vmem:[%s3687_s5 + $0xe0] sm:$0xff] %vm633_vm1, %v1234_v25  ;;  %v1119_v53 = vmax.f32 %v925_v49, 0.0 }
 0x234   :  { %1430 = vxpose.xlu1.b32.start [1/4] (short) %v1118_v33, 128  ;;  %1729 = vst.msk [vmem:[%s3687_s5 + $0x158] sm:$0xff] %vm633_vm1, %v1265_v26 }
 0x238   :  { %1400 = vxpose.xlu0.b32.cont [3/4] (short) %v1149_v40, 128  ;;  %1368 = vxpose.xlu2.b32.cont [3/4] (short) %v1148_v50, 128  ;;  %v954_v50 = vadd.f32 %v953_v46, %v2582_v34  ;;  %v927_v40 = vpop.f32.mrf.mxu1 }
 0x239   :  { %v1205_v54 = vpop.trf.xlu2  ;;  %v928_v29 = vadd.f32 %v927_v40, %v2590_v57 }
 0x23a   :  { %1701 = vst.msk [vmem:[%s3687_s5 + $0x78] sm:$0xff] %vm633_vm1, %v1205_v54  ;;  %v1235_v28 = vpop.trf.xlu0  ;;  %v1266_v30 = vpop.trf.xlu1  ;;  %v1120_v10 = vmax.f32 %v954_v50, 0.0 }
 0x23b   :  { %1715 = vst.msk [vmem:[%s3687_s5 + $0xe8] sm:$0xff] %vm633_vm1, %v1235_v28 }
 0x23c   :  { %1431 = vxpose.xlu1.b32.cont [2/4] (short) %v1134_v56, 128  ;;  %1730 = vst.msk [vmem:[%s3687_s5 + $0x160] sm:$0xff] %vm633_vm1, %v1266_v30  ;;  %v957_v56 = vadd.f32 %v956_v51, %v2590_v57 }
 0x23e   :  { %v1136_v62 = vmax.f32 %v957_v56, 0.0 }
 0x240   :  { %1401 = vxpose.xlu0.b32.end [4/4] (short) %v1165_v60, 128  ;;  %1369 = vxpose.xlu2.b32.end [4/4] (short) %v1164_v59, 128  ;;  %v930_v58 = vpop.f32.mrf.mxu1  ;;  %v959_v59 = vpop.f32.mrf.mxu2  ;;  %v1135_v60 = vmax.f32 %v928_v29, 0.0 }
 0x241   :  { %v1286_v63 = vpop.trf.xlu2  ;;  %v931_v4 = vadd.f32 %v930_v58, %v2595_v42 }
 0x242   :  { %1734 = vst.msk [vmem:[%s3687_s5 + $0x180] sm:$0xff] %vm633_vm1, %v1286_v63  ;;  %v1236_v32 = vpop.trf.xlu0  ;;  %v1267_v35 = vpop.trf.xlu1 }
 0x243   :  { %1716 = vst.msk [vmem:[%s3687_s5 + $0xf0] sm:$0xff] %vm633_vm1, %v1236_v32  ;;  %v985_v63 = vpop.f32.mrf.mxu3 }
 0x244   :  { %1432 = vxpose.xlu1.b32.cont [3/4] (short) %v1150_v0, 128  ;;  %1731 = vst.msk [vmem:[%s3687_s5 + $0x168] sm:$0xff] %vm633_vm1, %v1267_v35  ;;  %v986_v7 = vadd.f32 %v985_v63, %v2590_v57 }
 0x248   :  { %v962_v11 = vpop.f32.mrf.mxu2 }
 0x249   :  { %v1287_v5 = vpop.trf.xlu2  ;;  %v963_v19 = vadd.f32 %v962_v11, %v2600_v12 }
 0x24a   :  { %1735 = vst.msk [vmem:[%s3687_s5 + $0x188] sm:$0xff] %vm633_vm1, %v1287_v5  ;;  %v1237_v37 = vpop.trf.xlu0  ;;  %v1268_v38 = vpop.trf.xlu1  ;;  %v960_v5 = vadd.f32 %v959_v59, %v2595_v42 }
 0x24b   :  { %1717 = vst.msk [vmem:[%s3687_s5 + $0xf8] sm:$0xff] %vm633_vm1, %v1237_v37  ;;  %v988_v15 = vpop.f32.mrf.mxu3  ;;  %v1168_v22 = vmax.f32 %v963_v19, 0.0 }
 0x24c   :  { %1433 = vxpose.xlu1.b32.end [4/4] (short) %v1166_v6, 128  ;;  %1732 = vst.msk [vmem:[%s3687_s5 + $0x170] sm:$0xff] %vm633_vm1, %v1268_v38  ;;  %v1151_v6 = vmax.f32 %v931_v4, 0.0  ;;  %v1152_v8 = vmax.f32 %v960_v5, 0.0  ;;  %v989_v21 = vadd.f32 %v988_v15, %v2595_v42 }
 0x251   :  { %v1288_v9 = vpop.trf.xlu2 }
 0x252   :  { %1736 = vst.msk [vmem:[%s3687_s5 + $0x190] sm:$0xff] %vm633_vm1, %v1288_v9  ;;  %v1318_v44 = vpop.trf.xlu0  ;;  %v1269_v45 = vpop.trf.xlu1 }
 0x253   :  { %1750 = vst.msk [vmem:[%s3687_s5 + $0x200] sm:$0xff] %vm633_vm1, %v1318_v44  ;;  %v933_v9 = vpop.f32.mrf.mxu1  ;;  %v991_v28 = vpop.f32.mrf.mxu3 }
 0x254   :  { %1733 = vst.msk [vmem:[%s3687_s5 + $0x178] sm:$0xff] %vm633_vm1, %v1269_v45  ;;  %v934_v18 = vadd.f32 %v933_v9, %v2600_v12  ;;  %v992_v30 = vadd.f32 %v991_v28, %v2600_v12  ;;  %v1069_v9 = vpop.f32.mrf.mxu2 }
 0x259   :  { %v1289_v14 = vpop.trf.xlu2 }
 0x25a   :  { %1737 = vst.msk [vmem:[%s3687_s5 + $0x198] sm:$0xff] %vm633_vm1, %v1289_v14  ;;  %v1319_v48 = vpop.trf.xlu0  ;;  %v1350_v39 = vpop.trf.xlu1 }
 0x25b   :  { %1751 = vst.msk [vmem:[%s3687_s5 + $0x208] sm:$0xff] %vm633_vm1, %v1319_v48 }
 0x25c   :  { %1766 = vst.msk [vmem:[%s3687_s5 + $0x280] sm:$0xff] %vm633_vm1, %v1350_v39 }
 0x261   :  { %v1290_v17 = vpop.trf.xlu2 }
 0x262   :  { %1738 = vst.msk [vmem:[%s3687_s5 + $0x1a0] sm:$0xff] %vm633_vm1, %v1290_v17  ;;  %v1320_v24 = vpop.trf.xlu0  ;;  %v1351_v54 = vpop.trf.xlu1  ;;  %v1137_v17 = vmax.f32 %v986_v7, 0.0 }
 0x263   :  { %1752 = vst.msk [vmem:[%s3687_s5 + $0x210] sm:$0xff] %vm633_vm1, %v1320_v24  ;;  %v1014_v7 = vpop.f32.mrf.mxu0 }
 0x264   :  { %1767 = vst.msk [vmem:[%s3687_s5 + $0x288] sm:$0xff] %vm633_vm1, %v1351_v54  ;;  %v1015_v15 = vadd.f32 %v1014_v7, %v2590_v57 }
 0x269   :  { %v1291_v20 = vpop.trf.xlu2 }
 0x26a   :  { %1739 = vst.msk [vmem:[%s3687_s5 + $0x1a8] sm:$0xff] %vm633_vm1, %v1291_v20  ;;  %v1321_v0 = vpop.trf.xlu0  ;;  %v1352_v1 = vpop.trf.xlu1  ;;  %v1167_v20 = vmax.f32 %v934_v18, 0.0 }
 0x26b   :  { %1753 = vst.msk [vmem:[%s3687_s5 + $0x218] sm:$0xff] %vm633_vm1, %v1321_v0  ;;  %v1017_v19 = vpop.f32.mrf.mxu0 }
 0x26c   :  { %1768 = vst.msk [vmem:[%s3687_s5 + $0x290] sm:$0xff] %vm633_vm1, %v1352_v1  ;;  %v1018_v28 = vadd.f32 %v1017_v19, %v2595_v42 }
 0x271   :  { %v1292_v23 = vpop.trf.xlu2 }
 0x272   :  { %1740 = vst.msk [vmem:[%s3687_s5 + $0x1b0] sm:$0xff] %vm633_vm1, %v1292_v23  ;;  %v1322_v13 = vpop.trf.xlu0  ;;  %v1353_v14 = vpop.trf.xlu1 }
 0x273   :  { %1754 = vst.msk [vmem:[%s3687_s5 + $0x220] sm:$0xff] %vm633_vm1, %v1322_v13 }
 0x274   :  { %1769 = vst.msk [vmem:[%s3687_s5 + $0x298] sm:$0xff] %vm633_vm1, %v1353_v14 }
 0x279   :  { %v1293_v27 = vpop.trf.xlu2 }
 0x27a   :  { %1741 = vst.msk [vmem:[%s3687_s5 + $0x1b8] sm:$0xff] %vm633_vm1, %v1293_v27  ;;  %v1323_v23 = vpop.trf.xlu0  ;;  %v1354_v25 = vpop.trf.xlu1  ;;  %v1153_v27 = vmax.f32 %v989_v21, 0.0  ;;  %v1138_v21 = vmax.f32 %v1015_v15, 0.0 }
 0x27b   :  { %1755 = vst.msk [vmem:[%s3687_s5 + $0x228] sm:$0xff] %vm633_vm1, %v1323_v23  ;;  %v1070_v23 = vadd.f32 %v1069_v9, %v2582_v34 }
 0x27c   :  { %1770 = vst.msk [vmem:[%s3687_s5 + $0x2a0] sm:$0xff] %vm633_vm1, %v1354_v25  ;;  %v1072_v25 = vpop.f32.mrf.mxu2 }
 0x281   :  { %v1294_v31 = vpop.trf.xlu2 }
 0x282   :  { %1742 = vst.msk [vmem:[%s3687_s5 + $0x1c0] sm:$0xff] %vm633_vm1, %v1294_v31  ;;  %v1324_v31 = vpop.trf.xlu0  ;;  %v1355_v32 = vpop.trf.xlu1 }
 0x283   :  { %1756 = vst.msk [vmem:[%s3687_s5 + $0x230] sm:$0xff] %vm633_vm1, %v1324_v31 }
 0x284   :  { %1771 = vst.msk [vmem:[%s3687_s5 + $0x2a8] sm:$0xff] %vm633_vm1, %v1355_v32 }
 0x289   :  { %v1295_v36 = vpop.trf.xlu2 }
 0x28a   :  { %1743 = vst.msk [vmem:[%s3687_s5 + $0x1c8] sm:$0xff] %vm633_vm1, %v1295_v36  ;;  %v1169_v36 = vmax.f32 %v992_v30, 0.0  ;;  %v1325_v37 = vpop.trf.xlu0  ;;  %v1356_v38 = vpop.trf.xlu1 }
 0x28b   :  { %1757 = vst.msk [vmem:[%s3687_s5 + $0x238] sm:$0xff] %vm633_vm1, %v1325_v37  ;;  %v1073_v37 = vadd.f32 %v1072_v25, %v2590_v57 }
 0x28c   :  { %1772 = vst.msk [vmem:[%s3687_s5 + $0x2b0] sm:$0xff] %vm633_vm1, %v1356_v38  ;;  %v1020_v38 = vpop.f32.mrf.mxu0 }
 0x291   :  { %v1296_v41 = vpop.trf.xlu2 }
 0x292   :  { %1744 = vst.msk [vmem:[%s3687_s5 + $0x1d0] sm:$0xff] %vm633_vm1, %v1296_v41  ;;  %v1326_v43 = vpop.trf.xlu0  ;;  %v1357_v44 = vpop.trf.xlu1 }
 0x293   :  { %1758 = vst.msk [vmem:[%s3687_s5 + $0x240] sm:$0xff] %vm633_vm1, %v1326_v43  ;;  %v1075_v43 = vpop.f32.mrf.mxu2 }
 0x294   :  { %1773 = vst.msk [vmem:[%s3687_s5 + $0x2b8] sm:$0xff] %vm633_vm1, %v1357_v44 }
 0x299   :  { %v1297_v47 = vpop.trf.xlu2 }
 0x29a   :  { %1745 = vst.msk [vmem:[%s3687_s5 + $0x1d8] sm:$0xff] %vm633_vm1, %v1297_v47  ;;  %v1327_v46 = vpop.trf.xlu0  ;;  %v1358_v47 = vpop.trf.xlu1 }
 0x29b   :  { %1759 = vst.msk [vmem:[%s3687_s5 + $0x248] sm:$0xff] %vm633_vm1, %v1327_v46  ;;  %v1021_v46 = vadd.f32 %v1020_v38, %v2600_v12 }
 0x29c   :  { %1774 = vst.msk [vmem:[%s3687_s5 + $0x2c0] sm:$0xff] %vm633_vm1, %v1358_v47 }
 0x2a1   :  { %v1298_v33 = vpop.trf.xlu2 }
 0x2a2   :  { %1746 = vst.msk [vmem:[%s3687_s5 + $0x1e0] sm:$0xff] %vm633_vm1, %v1298_v33  ;;  %v1328_v39 = vpop.trf.xlu0  ;;  %v1359_v33 = vpop.trf.xlu1 }
 0x2a3   :  { %1760 = vst.msk [vmem:[%s3687_s5 + $0x250] sm:$0xff] %vm633_vm1, %v1328_v39 }
 0x2a4   :  { %1775 = vst.msk [vmem:[%s3687_s5 + $0x2c8] sm:$0xff] %vm633_vm1, %v1359_v33  ;;  %v1170_v33 = vmax.f32 %v1021_v46, 0.0 }
 0x2a8   :  { %1494 = vxpose.xlu0.b32.start [1/4] (short) %v1120_v10, 128  ;;  %1462 = vxpose.xlu2.b32.start [1/4] (short) %v1119_v53, 128 }
 0x2a9   :  { %v1299_v55 = vpop.trf.xlu2 }
 0x2aa   :  { %1747 = vst.msk [vmem:[%s3687_s5 + $0x1e8] sm:$0xff] %vm633_vm1, %v1299_v55  ;;  %v1329_v50 = vpop.trf.xlu0  ;;  %v1360_v40 = vpop.trf.xlu1 }
 0x2ab   :  { %1761 = vst.msk [vmem:[%s3687_s5 + $0x258] sm:$0xff] %vm633_vm1, %v1329_v50  ;;  %v1076_v50 = vadd.f32 %v1075_v43, %v2595_v42 }
 0x2ac   :  { %1776 = vst.msk [vmem:[%s3687_s5 + $0x2d0] sm:$0xff] %vm633_vm1, %v1360_v40 }
 0x2b0   :  { %1495 = vxpose.xlu0.b32.cont [2/4] (short) %v1136_v62, 128  ;;  %1463 = vxpose.xlu2.b32.cont [2/4] (short) %v1135_v60, 128  ;;  %v1040_v62 = vpop.f32.mrf.mxu1 }
 0x2b1   :  { %v1300_v2 = vpop.trf.xlu2  ;;  %v1041_v4 = vadd.f32 %v1040_v62, %v2582_v34 }
 0x2b2   :  { %1748 = vst.msk [vmem:[%s3687_s5 + $0x1f0] sm:$0xff] %vm633_vm1, %v1300_v2  ;;  %v1330_v52 = vpop.trf.xlu0  ;;  %v1361_v53 = vpop.trf.xlu1 }
 0x2b3   :  { %1762 = vst.msk [vmem:[%s3687_s5 + $0x260] sm:$0xff] %vm633_vm1, %v1330_v52  ;;  %v1123_v13 = vmax.f32 %v1041_v4, 0.0 }
 0x2b4   :  { %1526 = vxpose.xlu1.b32.start [1/4] (short) %v1121_v3, 128  ;;  %1777 = vst.msk [vmem:[%s3687_s5 + $0x2d8] sm:$0xff] %vm633_vm1, %v1361_v53  ;;  %v1012_v3 = vadd.f32 %v1011_v61, %v2582_v34 }
 0x2b6   :  { %v1122_v11 = vmax.f32 %v1012_v3, 0.0 }
 0x2b8   :  { %1496 = vxpose.xlu0.b32.cont [3/4] (short) %v1152_v8, 128  ;;  %1464 = vxpose.xlu2.b32.cont [3/4] (short) %v1151_v6, 128  ;;  %v1043_v8 = vpop.f32.mrf.mxu1 }
 0x2b9   :  { %v1301_v16 = vpop.trf.xlu2 }
 0x2ba   :  { %1749 = vst.msk [vmem:[%s3687_s5 + $0x1f8] sm:$0xff] %vm633_vm1, %v1301_v16  ;;  %v1331_v24 = vpop.trf.xlu0  ;;  %v1362_v54 = vpop.trf.xlu1  ;;  %v1044_v16 = vadd.f32 %v1043_v8, %v2590_v57 }
 0x2bb   :  { %1763 = vst.msk [vmem:[%s3687_s5 + $0x268] sm:$0xff] %vm633_vm1, %v1331_v24 }
 0x2bc   :  { %1527 = vxpose.xlu1.b32.cont [2/4] (short) %v1137_v17, 128  ;;  %1778 = vst.msk [vmem:[%s3687_s5 + $0x2e0] sm:$0xff] %vm633_vm1, %v1362_v54 }
 0x2c0   :  { %1497 = vxpose.xlu0.b32.end [4/4] (short) %v1168_v22, 128  ;;  %1465 = vxpose.xlu2.b32.end [4/4] (short) %v1167_v20, 128  ;;  %v1046_v20 = vpop.f32.mrf.mxu1  ;;  %v1139_v22 = vmax.f32 %v1044_v16, 0.0 }
 0x2c1   :  { %v1382_v26 = vpop.trf.xlu2  ;;  %v1047_v30 = vadd.f32 %v1046_v20, %v2595_v42 }
 0x2c2   :  { %1782 = vst.msk [vmem:[%s3687_s5 + $0x300] sm:$0xff] %vm633_vm1, %v1382_v26  ;;  %v1332_v29 = vpop.trf.xlu0  ;;  %v1363_v56 = vpop.trf.xlu1 }
 0x2c3   :  { %1764 = vst.msk [vmem:[%s3687_s5 + $0x270] sm:$0xff] %vm633_vm1, %v1332_v29 }
 0x2c4   :  { %1528 = vxpose.xlu1.b32.cont [3/4] (short) %v1153_v27, 128  ;;  %1779 = vst.msk [vmem:[%s3687_s5 + $0x2e8] sm:$0xff] %vm633_vm1, %v1363_v56  ;;  %v1124_v27 = vmax.f32 %v1070_v23, 0.0  ;;  %v1098_v23 = vpop.f32.mrf.mxu3 }
 0x2c9   :  { %v1383_v35 = vpop.trf.xlu2 }
 0x2ca   :  { %1783 = vst.msk [vmem:[%s3687_s5 + $0x308] sm:$0xff] %vm633_vm1, %v1383_v35  ;;  %v1364_v59 = vpop.trf.xlu1  ;;  %v1333_v1 = vpop.trf.xlu0  ;;  %v1154_v35 = vmax.f32 %v1018_v28, 0.0 }
 0x2cb   :  { %1780 = vst.msk [vmem:[%s3687_s5 + $0x2f0] sm:$0xff] %vm633_vm1, %v1364_v59 }
 0x2cc   :  { %1529 = vxpose.xlu1.b32.end [4/4] (short) %v1169_v36, 128  ;;  %1765 = vst.msk [vmem:[%s3687_s5 + $0x278] sm:$0xff] %vm633_vm1, %v1333_v1  ;;  %v1155_v36 = vmax.f32 %v1047_v30, 0.0  ;;  %v1099_v30 = vadd.f32 %v1098_v23, %v2582_v34 }
 0x2d1   :  { %v1384_v41 = vpop.trf.xlu2 }
 0x2d2   :  { %1784 = vst.msk [vmem:[%s3687_s5 + $0x310] sm:$0xff] %vm633_vm1, %v1384_v41  ;;  %v1365_v0 = vpop.trf.xlu1  ;;  %v1414_v6 = vpop.trf.xlu0 }
 0x2d3   :  { %1781 = vst.msk [vmem:[%s3687_s5 + $0x2f8] sm:$0xff] %vm633_vm1, %v1365_v0  ;;  %v1049_v41 = vpop.f32.mrf.mxu1 }
 0x2d4   :  { %1798 = vst.msk [vmem:[%s3687_s5 + $0x380] sm:$0xff] %vm633_vm1, %v1414_v6  ;;  %v1050_v47 = vadd.f32 %v1049_v41, %v2600_v12 }
 0x2d9   :  { %v1385_v45 = vpop.trf.xlu2 }
 0x2da   :  { %1785 = vst.msk [vmem:[%s3687_s5 + $0x318] sm:$0xff] %vm633_vm1, %v1385_v45  ;;  %v1446_v5 = vpop.trf.xlu1  ;;  %v1415_v18 = vpop.trf.xlu0  ;;  %v1140_v45 = vmax.f32 %v1073_v37, 0.0 }
 0x2db   :  { %1814 = vst.msk [vmem:[%s3687_s5 + $0x400] sm:$0xff] %vm633_vm1, %v1446_v5 }
 0x2dc   :  { %1799 = vst.msk [vmem:[%s3687_s5 + $0x388] sm:$0xff] %vm633_vm1, %v1415_v18 }
 0x2e1   :  { %v1386_v48 = vpop.trf.xlu2 }
 0x2e2   :  { %1786 = vst.msk [vmem:[%s3687_s5 + $0x320] sm:$0xff] %vm633_vm1, %v1386_v48  ;;  %v1447_v17 = vpop.trf.xlu1  ;;  %v1416_v32 = vpop.trf.xlu0 }
 0x2e3   :  { %1815 = vst.msk [vmem:[%s3687_s5 + $0x408] sm:$0xff] %vm633_vm1, %v1447_v17 }
 0x2e4   :  { %1800 = vst.msk [vmem:[%s3687_s5 + $0x390] sm:$0xff] %vm633_vm1, %v1416_v32 }
 0x2e9   :  { %v1387_v49 = vpop.trf.xlu2 }
 0x2ea   :  { %1787 = vst.msk [vmem:[%s3687_s5 + $0x328] sm:$0xff] %vm633_vm1, %v1387_v49  ;;  %v1448_v31 = vpop.trf.xlu1  ;;  %v1417_v39 = vpop.trf.xlu0  ;;  %v1171_v49 = vmax.f32 %v1050_v47, 0.0 }
 0x2eb   :  { %1816 = vst.msk [vmem:[%s3687_s5 + $0x410] sm:$0xff] %vm633_vm1, %v1448_v31 }
 0x2ec   :  { %1801 = vst.msk [vmem:[%s3687_s5 + $0x398] sm:$0xff] %vm633_vm1, %v1417_v39 }
 0x2f1   :  { %v1388_v51 = vpop.trf.xlu2 }
 0x2f2   :  { %1788 = vst.msk [vmem:[%s3687_s5 + $0x330] sm:$0xff] %vm633_vm1, %v1388_v51  ;;  %v1449_v48 = vpop.trf.xlu1  ;;  %v1156_v51 = vmax.f32 %v1076_v50, 0.0  ;;  %v1418_v53 = vpop.trf.xlu0 }
 0x2f3   :  { %1817 = vst.msk [vmem:[%s3687_s5 + $0x418] sm:$0xff] %vm633_vm1, %v1449_v48 }
 0x2f4   :  { %1802 = vst.msk [vmem:[%s3687_s5 + $0x3a0] sm:$0xff] %vm633_vm1, %v1418_v53 }
 0x2f9   :  { %v1389_v10 = vpop.trf.xlu2 }
 0x2fa   :  { %1789 = vst.msk [vmem:[%s3687_s5 + $0x338] sm:$0xff] %vm633_vm1, %v1389_v10  ;;  %v1450_v52 = vpop.trf.xlu1  ;;  %v1078_v10 = vpop.f32.mrf.mxu2 }
 0x2fb   :  { %1818 = vst.msk [vmem:[%s3687_s5 + $0x420] sm:$0xff] %vm633_vm1, %v1450_v52  ;;  %v1079_v24 = vadd.f32 %v1078_v10, %v2600_v12  ;;  %v1419_v56 = vpop.trf.xlu0 }
 0x2fc   :  { %1803 = vst.msk [vmem:[%s3687_s5 + $0x3a8] sm:$0xff] %vm633_vm1, %v1419_v56 }
 0x301   :  { %v1390_v55 = vpop.trf.xlu2 }
 0x302   :  { %1790 = vst.msk [vmem:[%s3687_s5 + $0x340] sm:$0xff] %vm633_vm1, %v1390_v55  ;;  %v1172_v55 = vmax.f32 %v1079_v24, 0.0  ;;  %v1451_v29 = vpop.trf.xlu1 }
 0x303   :  { %1819 = vst.msk [vmem:[%s3687_s5 + $0x428] sm:$0xff] %vm633_vm1, %v1451_v29 }
 0x309   :  { %v1391_v58 = vpop.trf.xlu2 }
 0x30a   :  { %1791 = vst.msk [vmem:[%s3687_s5 + $0x348] sm:$0xff] %vm633_vm1, %v1391_v58  ;;  %v1452_v59 = vpop.trf.xlu1 }
 0x30b   :  { %1820 = vst.msk [vmem:[%s3687_s5 + $0x430] sm:$0xff] %vm633_vm1, %v1452_v59 }
 0x311   :  { %v1392_v60 = vpop.trf.xlu2 }
 0x312   :  { %1792 = vst.msk [vmem:[%s3687_s5 + $0x350] sm:$0xff] %vm633_vm1, %v1392_v60  ;;  %v1420_v60 = vpop.trf.xlu0  ;;  %v1453_v62 = vpop.trf.xlu1 }
 0x313   :  { %1804 = vst.msk [vmem:[%s3687_s5 + $0x3b0] sm:$0xff] %vm633_vm1, %v1420_v60 }
 0x314   :  { %1821 = vst.msk [vmem:[%s3687_s5 + $0x438] sm:$0xff] %vm633_vm1, %v1453_v62 }
 0x319   :  { %v1393_v63 = vpop.trf.xlu2 }
 0x31a   :  { %1793 = vst.msk [vmem:[%s3687_s5 + $0x358] sm:$0xff] %vm633_vm1, %v1393_v63  ;;  %v1421_v63 = vpop.trf.xlu0  ;;  %v1454_v1 = vpop.trf.xlu1 }
 0x31b   :  { %1805 = vst.msk [vmem:[%s3687_s5 + $0x3b8] sm:$0xff] %vm633_vm1, %v1421_v63 }
 0x31c   :  { %1822 = vst.msk [vmem:[%s3687_s5 + $0x440] sm:$0xff] %vm633_vm1, %v1454_v1 }
 0x321   :  { %v1394_v2 = vpop.trf.xlu2 }
 0x322   :  { %1794 = vst.msk [vmem:[%s3687_s5 + $0x360] sm:$0xff] %vm633_vm1, %v1394_v2  ;;  %v1422_v2 = vpop.trf.xlu0  ;;  %v1455_v4 = vpop.trf.xlu1 }
 0x323   :  { %1806 = vst.msk [vmem:[%s3687_s5 + $0x3c0] sm:$0xff] %vm633_vm1, %v1422_v2 }
 0x324   :  { %1823 = vst.msk [vmem:[%s3687_s5 + $0x448] sm:$0xff] %vm633_vm1, %v1455_v4 }
 0x328   :  { %1590 = vxpose.xlu0.b32.start [1/4] (short) %v1123_v13, 128  ;;  %1558 = vxpose.xlu2.b32.start [1/4] (short) %v1122_v11, 128 }
 0x329   :  { %v1395_v14 = vpop.trf.xlu2 }
 0x32a   :  { %1795 = vst.msk [vmem:[%s3687_s5 + $0x368] sm:$0xff] %vm633_vm1, %v1395_v14  ;;  %v1423_v5 = vpop.trf.xlu0  ;;  %v1456_v7 = vpop.trf.xlu1 }
 0x32b   :  { %1807 = vst.msk [vmem:[%s3687_s5 + $0x3c8] sm:$0xff] %vm633_vm1, %v1423_v5 }
 0x32c   :  { %1824 = vst.msk [vmem:[%s3687_s5 + $0x450] sm:$0xff] %vm633_vm1, %v1456_v7 }
 0x330   :  { %1591 = vxpose.xlu0.b32.cont [2/4] (short) %v1139_v22, 128  ;;  %1559 = vxpose.xlu2.b32.cont [2/4] (short) %v1138_v21, 128 }
 0x331   :  { %v1396_v26 = vpop.trf.xlu2 }
 0x332   :  { %1796 = vst.msk [vmem:[%s3687_s5 + $0x370] sm:$0xff] %vm633_vm1, %v1396_v26  ;;  %v1424_v8 = vpop.trf.xlu0  ;;  %v1457_v11 = vpop.trf.xlu1 }
 0x333   :  { %1808 = vst.msk [vmem:[%s3687_s5 + $0x3d0] sm:$0xff] %vm633_vm1, %v1424_v8 }
 0x334   :  { %1622 = vxpose.xlu1.b32.start [1/4] (short) %v1124_v27, 128  ;;  %1825 = vst.msk [vmem:[%s3687_s5 + $0x458] sm:$0xff] %vm633_vm1, %v1457_v11 }
 0x338   :  { %1592 = vxpose.xlu0.b32.cont [3/4] (short) %v1155_v36, 128  ;;  %1560 = vxpose.xlu2.b32.cont [3/4] (short) %v1154_v35, 128  ;;  %v1101_v35 = vpop.f32.mrf.mxu3  ;;  %v1125_v36 = vmax.f32 %v1099_v30, 0.0 }
 0x339   :  { %v1397_v44 = vpop.trf.xlu2  ;;  %v1102_v37 = vadd.f32 %v1101_v35, %v2590_v57 }
 0x33a   :  { %1797 = vst.msk [vmem:[%s3687_s5 + $0x378] sm:$0xff] %vm633_vm1, %v1397_v44  ;;  %v1425_v13 = vpop.trf.xlu0  ;;  %v1458_v15 = vpop.trf.xlu1 }
 0x33b   :  { %1809 = vst.msk [vmem:[%s3687_s5 + $0x3d8] sm:$0xff] %vm633_vm1, %v1425_v13  ;;  %v1141_v44 = vmax.f32 %v1102_v37, 0.0 }
 0x33c   :  { %1623 = vxpose.xlu1.b32.cont [2/4] (short) %v1140_v45, 128  ;;  %1826 = vst.msk [vmem:[%s3687_s5 + $0x460] sm:$0xff] %vm633_vm1, %v1458_v15 }
 0x340   :  { %1593 = vxpose.xlu0.b32.end [4/4] (short) %v1171_v49, 128  ;;  %1561 = vxpose.xlu2.b32.end [4/4] (short) %v1170_v33, 128  ;;  %v1104_v43 = vpop.f32.mrf.mxu3 }
 0x341   :  { %v1478_v40 = vpop.trf.xlu2  ;;  %v1105_v45 = vadd.f32 %v1104_v43, %v2595_v42 }
 0x342   :  { %1830 = vst.msk [vmem:[%s3687_s5 + $0x480] sm:$0xff] %vm633_vm1, %v1478_v40  ;;  %v1426_v16 = vpop.trf.xlu0  ;;  %v1459_v18 = vpop.trf.xlu1 }
 0x343   :  { %1810 = vst.msk [vmem:[%s3687_s5 + $0x3e0] sm:$0xff] %vm633_vm1, %v1426_v16  ;;  %v1157_v48 = vmax.f32 %v1105_v45, 0.0 }
 0x344   :  { %1624 = vxpose.xlu1.b32.cont [3/4] (short) %v1156_v51, 128  ;;  %1827 = vst.msk [vmem:[%s3687_s5 + $0x468] sm:$0xff] %vm633_vm1, %v1459_v18 }
 0x348   :  { %v1107_v39 = vpop.f32.mrf.mxu3 }
 0x349   :  { %v1479_v54 = vpop.trf.xlu2  ;;  %v1108_v33 = vadd.f32 %v1107_v39, %v2600_v12 }
 0x34a   :  { %1831 = vst.msk [vmem:[%s3687_s5 + $0x488] sm:$0xff] %vm633_vm1, %v1479_v54  ;;  %v1427_v19 = vpop.trf.xlu0  ;;  %v1460_v21 = vpop.trf.xlu1 }
 0x34b   :  { %1811 = vst.msk [vmem:[%s3687_s5 + $0x3e8] sm:$0xff] %vm633_vm1, %v1427_v19  ;;  %v1173_v40 = vmax.f32 %v1108_v33, 0.0 }
 0x34c   :  { %1625 = vxpose.xlu1.b32.end [4/4] (short) %v1172_v55, 128  ;;  %1828 = vst.msk [vmem:[%s3687_s5 + $0x470] sm:$0xff] %vm633_vm1, %v1460_v21 }
 0x351   :  { %v1480_v58 = vpop.trf.xlu2 }
 0x352   :  { %1832 = vst.msk [vmem:[%s3687_s5 + $0x490] sm:$0xff] %vm633_vm1, %v1480_v58  ;;  %v1428_v22 = vpop.trf.xlu0  ;;  %v1461_v26 = vpop.trf.xlu1 }
 0x353   :  { %1812 = vst.msk [vmem:[%s3687_s5 + $0x3f0] sm:$0xff] %vm633_vm1, %v1428_v22 }
 0x354   :  { %1829 = vst.msk [vmem:[%s3687_s5 + $0x478] sm:$0xff] %vm633_vm1, %v1461_v26 }
 0x359   :  { %v1481_v61 = vpop.trf.xlu2 }
 0x35a   :  { %1833 = vst.msk [vmem:[%s3687_s5 + $0x498] sm:$0xff] %vm633_vm1, %v1481_v61  ;;  %v1429_v27 = vpop.trf.xlu0  ;;  %v1542_v31 = vpop.trf.xlu1 }
 0x35b   :  { %1813 = vst.msk [vmem:[%s3687_s5 + $0x3f8] sm:$0xff] %vm633_vm1, %v1429_v27 }
 0x35c   :  { %1862 = vst.msk [vmem:[%s3687_s5 + $0x580] sm:$0xff] %vm633_vm1, %v1542_v31 }
 0x361   :  { %v1482_v0 = vpop.trf.xlu2 }
 0x362   :  { %1834 = vst.msk [vmem:[%s3687_s5 + $0x4a0] sm:$0xff] %vm633_vm1, %v1482_v0  ;;  %v1510_v32 = vpop.trf.xlu0  ;;  %v1543_v38 = vpop.trf.xlu1 }
 0x363   :  { %1846 = vst.msk [vmem:[%s3687_s5 + $0x500] sm:$0xff] %vm633_vm1, %v1510_v32 }
 0x364   :  { %1863 = vst.msk [vmem:[%s3687_s5 + $0x588] sm:$0xff] %vm633_vm1, %v1543_v38 }
 0x369   :  { %v1483_v3 = vpop.trf.xlu2 }
 0x36a   :  { %1835 = vst.msk [vmem:[%s3687_s5 + $0x4a8] sm:$0xff] %vm633_vm1, %v1483_v3  ;;  %v1511_v41 = vpop.trf.xlu0  ;;  %v1544_v46 = vpop.trf.xlu1 }
 0x36b   :  { %1847 = vst.msk [vmem:[%s3687_s5 + $0x508] sm:$0xff] %vm633_vm1, %v1511_v41 }
 0x36c   :  { %1864 = vst.msk [vmem:[%s3687_s5 + $0x590] sm:$0xff] %vm633_vm1, %v1544_v46 }
 0x371   :  { %v1484_v6 = vpop.trf.xlu2 }
 0x372   :  { %1836 = vst.msk [vmem:[%s3687_s5 + $0x4b0] sm:$0xff] %vm633_vm1, %v1484_v6  ;;  %v1512_v47 = vpop.trf.xlu0  ;;  %v1545_v49 = vpop.trf.xlu1 }
 0x373   :  { %1848 = vst.msk [vmem:[%s3687_s5 + $0x510] sm:$0xff] %vm633_vm1, %v1512_v47 }
 0x374   :  { %1865 = vst.msk [vmem:[%s3687_s5 + $0x598] sm:$0xff] %vm633_vm1, %v1545_v49 }
 0x379   :  { %v1485_v9 = vpop.trf.xlu2 }
 0x37a   :  { %1837 = vst.msk [vmem:[%s3687_s5 + $0x4b8] sm:$0xff] %vm633_vm1, %v1485_v9  ;;  %v1513_v50 = vpop.trf.xlu0  ;;  %v1546_v51 = vpop.trf.xlu1 }
 0x37b   :  { %1849 = vst.msk [vmem:[%s3687_s5 + $0x518] sm:$0xff] %vm633_vm1, %v1513_v50 }
 0x37c   :  { %1866 = vst.msk [vmem:[%s3687_s5 + $0x5a0] sm:$0xff] %vm633_vm1, %v1546_v51 }
 0x381   :  { %v1486_v14 = vpop.trf.xlu2 }
 0x382   :  { %1838 = vst.msk [vmem:[%s3687_s5 + $0x4c0] sm:$0xff] %vm633_vm1, %v1486_v14  ;;  %v1514_v52 = vpop.trf.xlu0  ;;  %v1547_v10 = vpop.trf.xlu1 }
 0x383   :  { %1850 = vst.msk [vmem:[%s3687_s5 + $0x520] sm:$0xff] %vm633_vm1, %v1514_v52 }
 0x384   :  { %1867 = vst.msk [vmem:[%s3687_s5 + $0x5a8] sm:$0xff] %vm633_vm1, %v1547_v10 }
 0x389   :  { %v1487_v17 = vpop.trf.xlu2 }
 0x38a   :  { %1839 = vst.msk [vmem:[%s3687_s5 + $0x4c8] sm:$0xff] %vm633_vm1, %v1487_v17  ;;  %v1515_v24 = vpop.trf.xlu0  ;;  %v1548_v55 = vpop.trf.xlu1 }
 0x38b   :  { %1851 = vst.msk [vmem:[%s3687_s5 + $0x528] sm:$0xff] %vm633_vm1, %v1515_v24 }
 0x38c   :  { %1868 = vst.msk [vmem:[%s3687_s5 + $0x5b0] sm:$0xff] %vm633_vm1, %v1548_v55 }
 0x391   :  { %v1488_v20 = vpop.trf.xlu2 }
 0x392   :  { %1840 = vst.msk [vmem:[%s3687_s5 + $0x4d0] sm:$0xff] %vm633_vm1, %v1488_v20  ;;  %v1516_v29 = vpop.trf.xlu0  ;;  %v1549_v58 = vpop.trf.xlu1 }
 0x393   :  { %1852 = vst.msk [vmem:[%s3687_s5 + $0x530] sm:$0xff] %vm633_vm1, %v1516_v29 }
 0x394   :  { %1869 = vst.msk [vmem:[%s3687_s5 + $0x5b8] sm:$0xff] %vm633_vm1, %v1549_v58 }
 0x399   :  { %v1489_v25 = vpop.trf.xlu2 }
 0x39a   :  { %1841 = vst.msk [vmem:[%s3687_s5 + $0x4d8] sm:$0xff] %vm633_vm1, %v1489_v25  ;;  %v1517_v59 = vpop.trf.xlu0  ;;  %v1550_v61 = vpop.trf.xlu1 }
 0x39b   :  { %1853 = vst.msk [vmem:[%s3687_s5 + $0x538] sm:$0xff] %vm633_vm1, %v1517_v59 }
 0x39c   :  { %1870 = vst.msk [vmem:[%s3687_s5 + $0x5c0] sm:$0xff] %vm633_vm1, %v1550_v61 }
 0x3a1   :  { %v1490_v28 = vpop.trf.xlu2 }
 0x3a2   :  { %1842 = vst.msk [vmem:[%s3687_s5 + $0x4e0] sm:$0xff] %vm633_vm1, %v1490_v28  ;;  %v1518_v62 = vpop.trf.xlu0  ;;  %v1551_v0 = vpop.trf.xlu1 }
 0x3a3   :  { %1854 = vst.msk [vmem:[%s3687_s5 + $0x540] sm:$0xff] %vm633_vm1, %v1518_v62 }
 0x3a4   :  { %1871 = vst.msk [vmem:[%s3687_s5 + $0x5c8] sm:$0xff] %vm633_vm1, %v1551_v0 }
 0x3a8   :  { %1654 = vxpose.xlu2.b32.start [1/4] (short) %v1125_v36, 128 }
 0x3a9   :  { %v1491_v34 = vpop.trf.xlu2 }
 0x3aa   :  { %1843 = vst.msk [vmem:[%s3687_s5 + $0x4e8] sm:$0xff] %vm633_vm1, %v1491_v34  ;;  %v1519_v1 = vpop.trf.xlu0  ;;  %v1552_v3 = vpop.trf.xlu1 }
 0x3ab   :  { %1855 = vst.msk [vmem:[%s3687_s5 + $0x548] sm:$0xff] %vm633_vm1, %v1519_v1 }
 0x3ac   :  { %1872 = vst.msk [vmem:[%s3687_s5 + $0x5d0] sm:$0xff] %vm633_vm1, %v1552_v3 }
 0x3b0   :  { %1655 = vxpose.xlu2.b32.cont [2/4] (short) %v1141_v44, 128 }
 0x3b1   :  { %v1492_v57 = vpop.trf.xlu2 }
 0x3b2   :  { %1844 = vst.msk [vmem:[%s3687_s5 + $0x4f0] sm:$0xff] %vm633_vm1, %v1492_v57  ;;  %v1520_v4 = vpop.trf.xlu0  ;;  %v1553_v6 = vpop.trf.xlu1 }
 0x3b3   :  { %1856 = vst.msk [vmem:[%s3687_s5 + $0x550] sm:$0xff] %vm633_vm1, %v1520_v4 }
 0x3b4   :  { %1873 = vst.msk [vmem:[%s3687_s5 + $0x5d8] sm:$0xff] %vm633_vm1, %v1553_v6 }
 0x3b8   :  { %1656 = vxpose.xlu2.b32.cont [3/4] (short) %v1157_v48, 128 }
 0x3b9   :  { %v1493_v42 = vpop.trf.xlu2 }
 0x3ba   :  { %1845 = vst.msk [vmem:[%s3687_s5 + $0x4f8] sm:$0xff] %vm633_vm1, %v1493_v42  ;;  %v1521_v7 = vpop.trf.xlu0  ;;  %v1554_v9 = vpop.trf.xlu1 }
 0x3bb   :  { %1857 = vst.msk [vmem:[%s3687_s5 + $0x558] sm:$0xff] %vm633_vm1, %v1521_v7 }
 0x3bc   :  { %1874 = vst.msk [vmem:[%s3687_s5 + $0x5e0] sm:$0xff] %vm633_vm1, %v1554_v9 }
 0x3c0   :  { %1657 = vxpose.xlu2.b32.end [4/4] (short) %v1173_v40, 128 }
 0x3c1   :  { %v1574_v12 = vpop.trf.xlu2 }
 0x3c2   :  { %1878 = vst.msk [vmem:[%s3687_s5 + $0x600] sm:$0xff] %vm633_vm1, %v1574_v12  ;;  %v1522_v11 = vpop.trf.xlu0  ;;  %v1555_v14 = vpop.trf.xlu1 }
 0x3c3   :  { %1858 = vst.msk [vmem:[%s3687_s5 + $0x560] sm:$0xff] %vm633_vm1, %v1522_v11 }
 0x3c4   :  { %1875 = vst.msk [vmem:[%s3687_s5 + $0x5e8] sm:$0xff] %vm633_vm1, %v1555_v14 }
 0x3c9   :  { %v1575_v53 = vpop.trf.xlu2 }
 0x3ca   :  { %1879 = vst.msk [vmem:[%s3687_s5 + $0x608] sm:$0xff] %vm633_vm1, %v1575_v53  ;;  %v1523_v15 = vpop.trf.xlu0  ;;  %v1556_v17 = vpop.trf.xlu1 }
 0x3cb   :  { %1859 = vst.msk [vmem:[%s3687_s5 + $0x568] sm:$0xff] %vm633_vm1, %v1523_v15 }
 0x3cc   :  { %1876 = vst.msk [vmem:[%s3687_s5 + $0x5f0] sm:$0xff] %vm633_vm1, %v1556_v17 }
 0x3d1   :  { %v1576_v54 = vpop.trf.xlu2 }
 0x3d2   :  { %1880 = vst.msk [vmem:[%s3687_s5 + $0x610] sm:$0xff] %vm633_vm1, %v1576_v54  ;;  %v1524_v18 = vpop.trf.xlu0  ;;  %v1557_v20 = vpop.trf.xlu1 }
 0x3d3   :  { %1860 = vst.msk [vmem:[%s3687_s5 + $0x570] sm:$0xff] %vm633_vm1, %v1524_v18 }
 0x3d4   :  { %1877 = vst.msk [vmem:[%s3687_s5 + $0x5f8] sm:$0xff] %vm633_vm1, %v1557_v20 }
 0x3d9   :  { %v1577_v56 = vpop.trf.xlu2 }
 0x3da   :  { %1881 = vst.msk [vmem:[%s3687_s5 + $0x618] sm:$0xff] %vm633_vm1, %v1577_v56  ;;  %v1525_v21 = vpop.trf.xlu0  ;;  %v1638_v23 = vpop.trf.xlu1 }
 0x3db   :  { %1861 = vst.msk [vmem:[%s3687_s5 + $0x578] sm:$0xff] %vm633_vm1, %v1525_v21 }
 0x3dc   :  { %1910 = vst.msk [vmem:[%s3687_s5 + $0x700] sm:$0xff] %vm633_vm1, %v1638_v23 }
 0x3e1   :  { %v1578_v60 = vpop.trf.xlu2 }
 0x3e2   :  { %1882 = vst.msk [vmem:[%s3687_s5 + $0x620] sm:$0xff] %vm633_vm1, %v1578_v60  ;;  %v1606_v25 = vpop.trf.xlu0  ;;  %v1639_v27 = vpop.trf.xlu1 }
 0x3e3   :  { %1894 = vst.msk [vmem:[%s3687_s5 + $0x680] sm:$0xff] %vm633_vm1, %v1606_v25 }
 0x3e4   :  { %1911 = vst.msk [vmem:[%s3687_s5 + $0x708] sm:$0xff] %vm633_vm1, %v1639_v27 }
 0x3e9   :  { %v1579_v63 = vpop.trf.xlu2 }
 0x3ea   :  { %1883 = vst.msk [vmem:[%s3687_s5 + $0x628] sm:$0xff] %vm633_vm1, %v1579_v63  ;;  %v1607_v28 = vpop.trf.xlu0  ;;  %v1640_v31 = vpop.trf.xlu1 }
 0x3eb   :  { %1895 = vst.msk [vmem:[%s3687_s5 + $0x688] sm:$0xff] %vm633_vm1, %v1607_v28 }
 0x3ec   :  { %1912 = vst.msk [vmem:[%s3687_s5 + $0x710] sm:$0xff] %vm633_vm1, %v1640_v31 }
 0x3f1   :  { %v1580_v2 = vpop.trf.xlu2 }
 0x3f2   :  { %1884 = vst.msk [vmem:[%s3687_s5 + $0x630] sm:$0xff] %vm633_vm1, %v1580_v2  ;;  %v1608_v32 = vpop.trf.xlu0  ;;  %v1641_v36 = vpop.trf.xlu1 }
 0x3f3   :  { %1896 = vst.msk [vmem:[%s3687_s5 + $0x690] sm:$0xff] %vm633_vm1, %v1608_v32 }
 0x3f4   :  { %1913 = vst.msk [vmem:[%s3687_s5 + $0x718] sm:$0xff] %vm633_vm1, %v1641_v36 }
 0x3f9   :  { %v1581_v5 = vpop.trf.xlu2 }
 0x3fa   :  { %1885 = vst.msk [vmem:[%s3687_s5 + $0x638] sm:$0xff] %vm633_vm1, %v1581_v5  ;;  %v1609_v34 = vpop.trf.xlu0  ;;  %v1642_v38 = vpop.trf.xlu1 }
 0x3fb   :  { %1897 = vst.msk [vmem:[%s3687_s5 + $0x698] sm:$0xff] %vm633_vm1, %v1609_v34 }
 0x3fc   :  { %1914 = vst.msk [vmem:[%s3687_s5 + $0x720] sm:$0xff] %vm633_vm1, %v1642_v38 }
 0x401   :  { %v1582_v8 = vpop.trf.xlu2 }
 0x402   :  { %1886 = vst.msk [vmem:[%s3687_s5 + $0x640] sm:$0xff] %vm633_vm1, %v1582_v8  ;;  %v1610_v41 = vpop.trf.xlu0  ;;  %v1643_v44 = vpop.trf.xlu1 }
 0x403   :  { %1898 = vst.msk [vmem:[%s3687_s5 + $0x6a0] sm:$0xff] %vm633_vm1, %v1610_v41 }
 0x404   :  { %1915 = vst.msk [vmem:[%s3687_s5 + $0x728] sm:$0xff] %vm633_vm1, %v1643_v44 }
 0x409   :  { %v1583_v13 = vpop.trf.xlu2 }
 0x40a   :  { %1887 = vst.msk [vmem:[%s3687_s5 + $0x648] sm:$0xff] %vm633_vm1, %v1583_v13  ;;  %v1611_v57 = vpop.trf.xlu0  ;;  %v1644_v46 = vpop.trf.xlu1 }
 0x40b   :  { %1899 = vst.msk [vmem:[%s3687_s5 + $0x6a8] sm:$0xff] %vm633_vm1, %v1611_v57 }
 0x40c   :  { %1916 = vst.msk [vmem:[%s3687_s5 + $0x730] sm:$0xff] %vm633_vm1, %v1644_v46 }
 0x411   :  { %v1584_v16 = vpop.trf.xlu2 }
 0x412   :  { %1888 = vst.msk [vmem:[%s3687_s5 + $0x650] sm:$0xff] %vm633_vm1, %v1584_v16  ;;  %v1612_v47 = vpop.trf.xlu0  ;;  %v1645_v39 = vpop.trf.xlu1 }
 0x413   :  { %1900 = vst.msk [vmem:[%s3687_s5 + $0x6b0] sm:$0xff] %vm633_vm1, %v1612_v47 }
 0x414   :  { %1917 = vst.msk [vmem:[%s3687_s5 + $0x738] sm:$0xff] %vm633_vm1, %v1645_v39 }
 0x419   :  { %v1585_v19 = vpop.trf.xlu2 }
 0x41a   :  { %1889 = vst.msk [vmem:[%s3687_s5 + $0x658] sm:$0xff] %vm633_vm1, %v1585_v19  ;;  %v1613_v42 = vpop.trf.xlu0  ;;  %v1646_v49 = vpop.trf.xlu1 }
 0x41b   :  { %1901 = vst.msk [vmem:[%s3687_s5 + $0x6b8] sm:$0xff] %vm633_vm1, %v1613_v42 }
 0x41c   :  { %1918 = vst.msk [vmem:[%s3687_s5 + $0x740] sm:$0xff] %vm633_vm1, %v1646_v49 }
 0x421   :  { %v1586_v22 = vpop.trf.xlu2 }
 0x422   :  { %1890 = vst.msk [vmem:[%s3687_s5 + $0x660] sm:$0xff] %vm633_vm1, %v1586_v22  ;;  %v1614_v50 = vpop.trf.xlu0  ;;  %v1647_v12 = vpop.trf.xlu1 }
 0x423   :  { %1902 = vst.msk [vmem:[%s3687_s5 + $0x6c0] sm:$0xff] %vm633_vm1, %v1614_v50 }
 0x424   :  { %1919 = vst.msk [vmem:[%s3687_s5 + $0x748] sm:$0xff] %vm633_vm1, %v1647_v12 }
 0x429   :  { %v1587_v26 = vpop.trf.xlu2 }
 0x42a   :  { %1891 = vst.msk [vmem:[%s3687_s5 + $0x668] sm:$0xff] %vm633_vm1, %v1587_v26  ;;  %v1615_v51 = vpop.trf.xlu0  ;;  %v1648_v53 = vpop.trf.xlu1 }
 0x42b   :  { %1903 = vst.msk [vmem:[%s3687_s5 + $0x6c8] sm:$0xff] %vm633_vm1, %v1615_v51 }
 0x42c   :  { %1920 = vst.msk [vmem:[%s3687_s5 + $0x750] sm:$0xff] %vm633_vm1, %v1648_v53 }
 0x431   :  { %v1588_v30 = vpop.trf.xlu2 }
 0x432   :  { %1892 = vst.msk [vmem:[%s3687_s5 + $0x670] sm:$0xff] %vm633_vm1, %v1588_v30  ;;  %v1616_v10 = vpop.trf.xlu0  ;;  %v1649_v54 = vpop.trf.xlu1 }
 0x433   :  { %1904 = vst.msk [vmem:[%s3687_s5 + $0x6d0] sm:$0xff] %vm633_vm1, %v1616_v10 }
 0x434   :  { %1921 = vst.msk [vmem:[%s3687_s5 + $0x758] sm:$0xff] %vm633_vm1, %v1649_v54 }
 0x439   :  { %v1589_v35 = vpop.trf.xlu2 }
 0x43a   :  { %1893 = vst.msk [vmem:[%s3687_s5 + $0x678] sm:$0xff] %vm633_vm1, %v1589_v35  ;;  %v1617_v55 = vpop.trf.xlu0  ;;  %v1650_v56 = vpop.trf.xlu1 }
 0x43b   :  { %1905 = vst.msk [vmem:[%s3687_s5 + $0x6d8] sm:$0xff] %vm633_vm1, %v1617_v55 }
 0x43c   :  { %1922 = vst.msk [vmem:[%s3687_s5 + $0x760] sm:$0xff] %vm633_vm1, %v1650_v56 }
 0x441   :  { %v1670_v37 = vpop.trf.xlu2 }
 0x442   :  { %1926 = vst.msk [vmem:[%s3687_s5 + $0x780] sm:$0xff] %vm633_vm1, %v1670_v37  ;;  %v1618_v58 = vpop.trf.xlu0  ;;  %v1651_v60 = vpop.trf.xlu1 }
 0x443   :  { %1906 = vst.msk [vmem:[%s3687_s5 + $0x6e0] sm:$0xff] %vm633_vm1, %v1618_v58 }
 0x444   :  { %1923 = vst.msk [vmem:[%s3687_s5 + $0x768] sm:$0xff] %vm633_vm1, %v1651_v60 }
 0x449   :  { %v1671_v43 = vpop.trf.xlu2 }
 0x44a   :  { %1927 = vst.msk [vmem:[%s3687_s5 + $0x788] sm:$0xff] %vm633_vm1, %v1671_v43  ;;  %v1619_v61 = vpop.trf.xlu0  ;;  %v1652_v63 = vpop.trf.xlu1 }
 0x44b   :  { %1907 = vst.msk [vmem:[%s3687_s5 + $0x6e8] sm:$0xff] %vm633_vm1, %v1619_v61 }
 0x44c   :  { %1924 = vst.msk [vmem:[%s3687_s5 + $0x770] sm:$0xff] %vm633_vm1, %v1652_v63 }
 0x451   :  { %v1672_v45 = vpop.trf.xlu2 }
 0x452   :  { %1928 = vst.msk [vmem:[%s3687_s5 + $0x790] sm:$0xff] %vm633_vm1, %v1672_v45  ;;  %v1620_v0 = vpop.trf.xlu0  ;;  %v1653_v2 = vpop.trf.xlu1 }
 0x453   :  { %1908 = vst.msk [vmem:[%s3687_s5 + $0x6f0] sm:$0xff] %vm633_vm1, %v1620_v0 }
 0x454   :  { %1925 = vst.msk [vmem:[%s3687_s5 + $0x778] sm:$0xff] %vm633_vm1, %v1653_v2 }
 0x459   :  { %v1673_v48 = vpop.trf.xlu2 }
 0x45a   :  { %1929 = vst.msk [vmem:[%s3687_s5 + $0x798] sm:$0xff] %vm633_vm1, %v1673_v48  ;;  %v1621_v3 = vpop.trf.xlu0 }
 0x45b   :  { %1909 = vst.msk [vmem:[%s3687_s5 + $0x6f8] sm:$0xff] %vm633_vm1, %v1621_v3 }
 0x461   :  { %v1674_v33 = vpop.trf.xlu2 }
 0x462   :  { %1930 = vst.msk [vmem:[%s3687_s5 + $0x7a0] sm:$0xff] %vm633_vm1, %v1674_v33 }
 0x469   :  { %v1675_v40 = vpop.trf.xlu2 }
 0x46a   :  { %1931 = vst.msk [vmem:[%s3687_s5 + $0x7a8] sm:$0xff] %vm633_vm1, %v1675_v40 }
 0x471   :  { %v1676_v52 = vpop.trf.xlu2 }
 0x472   :  { %1932 = vst.msk [vmem:[%s3687_s5 + $0x7b0] sm:$0xff] %vm633_vm1, %v1676_v52 }
 0x479   :  { %v1677_v24 = vpop.trf.xlu2 }
 0x47a   :  { %1933 = vst.msk [vmem:[%s3687_s5 + $0x7b8] sm:$0xff] %vm633_vm1, %v1677_v24 }
 0x481   :  { %v1678_v29 = vpop.trf.xlu2 }
 0x482   :  { %1934 = vst.msk [vmem:[%s3687_s5 + $0x7c0] sm:$0xff] %vm633_vm1, %v1678_v29 }
 0x489   :  { %v1679_v59 = vpop.trf.xlu2 }
 0x48a   :  { %1935 = vst.msk [vmem:[%s3687_s5 + $0x7c8] sm:$0xff] %vm633_vm1, %v1679_v59 }
 0x491   :  { %v1680_v62 = vpop.trf.xlu2 }
 0x492   :  { %1936 = vst.msk [vmem:[%s3687_s5 + $0x7d0] sm:$0xff] %vm633_vm1, %v1680_v62 }
 0x499   :  { %v1681_v1 = vpop.trf.xlu2 }
 0x49a   :  { %1937 = vst.msk [vmem:[%s3687_s5 + $0x7d8] sm:$0xff] %vm633_vm1, %v1681_v1 }
 0x4a1   :  { %v1682_v4 = vpop.trf.xlu2 }
 0x4a2   :  { %1938 = vst.msk [vmem:[%s3687_s5 + $0x7e0] sm:$0xff] %vm633_vm1, %v1682_v4 }
 0x4a9   :  { %v1683_v5 = vpop.trf.xlu2 }
 0x4aa   :  { %1939 = vst.msk [vmem:[%s3687_s5 + $0x7e8] sm:$0xff] %vm633_vm1, %v1683_v5 }
 0x4b1   :  { %v1684_v6 = vpop.trf.xlu2 }
 0x4b2   :  { %1940 = vst.msk [vmem:[%s3687_s5 + $0x7f0] sm:$0xff] %vm633_vm1, %v1684_v6 }
 0x4b9   :  { %v1685_v7 = vpop.trf.xlu2 }
 0x4ba   :  { %1941 = vst.msk [vmem:[%s3687_s5 + $0x7f8] sm:$0xff] %vm633_vm1, %v1685_v7 }

</bundles_post_ra>
